<compile_context>
chip_gen: v6e
topology: v6e:2x2x1
jax: 0.10.0
libtpu: 0.0.40
codegen_flags: <defaults>
</compile_context>

<pallas_src>
import functools

import jax
import jax.numpy as jnp
from jax.experimental import pallas as pl
from jax.experimental.pallas import tpu as pltpu

DROPOUT_P = 0.5
INPUT_SIZE = 28 * 28
NUM_CLASSES = 10
HIDDEN = (512, 256, 128)
PADDED_CLASSES = 128          # lane-dense output block; sliced to 10 in wrapper


def _round_up(n, m):
    return (n + m - 1) // m * m


def _simple_fc_kernel(x_ref,
                      w1_ref, b1_ref, m1_ref,
                      w2_ref, b2_ref, m2_ref,
                      w3_ref, b3_ref, m3_ref,
                      w4_ref, b4_ref,
                      o_ref):
    # Layer 1: (TB,784)bf16 @ (784,512)bf16 -> f32 acc; bias/ReLU/dropout in f32.
    h = jnp.dot(x_ref[...], w1_ref[...],
                preferred_element_type=jnp.float32) + b1_ref[...]
    h = jnp.maximum(h, 0.0) * m1_ref[...]

    # Layer 2
    h = jnp.dot(h.astype(jnp.bfloat16), w2_ref[...],
                preferred_element_type=jnp.float32) + b2_ref[...]
    h = jnp.maximum(h, 0.0) * m2_ref[...]

    # Layer 3
    h = jnp.dot(h.astype(jnp.bfloat16), w3_ref[...],
                preferred_element_type=jnp.float32) + b3_ref[...]
    h = jnp.maximum(h, 0.0) * m3_ref[...]

    # Output layer (classes padded to 128 lanes -> unmasked vector stores).
    o_ref[...] = jnp.dot(h.astype(jnp.bfloat16), w4_ref[...],
                         preferred_element_type=jnp.float32) + b4_ref[...]


@functools.partial(jax.jit, static_argnames=("block_batch",))
def simple_fc_forward(x, params, key, *, block_batch=256):
    """x: (B, 784) f32; params: (w1,b1,...,w4,b4) with wk (in,out), bk (out,)."""
    w1, b1, w2, b2, w3, b3, w4, b4 = params
    B = x.shape[0]

    # Batch tile: up to block_batch rows (MXU-height friendly), multiple of 8.
    TB = min(block_batch, _round_up(B, 8))
    Bp = _round_up(B, TB)

    # Inverted-dropout masks (training semantics): 0 with prob p, 1/(1-p) else.
    k1, k2, k3 = jax.random.split(key, 3)
    scale = 1.0 / (1.0 - DROPOUT_P)
    m1 = jax.random.bernoulli(k1, 1.0 - DROPOUT_P, (Bp, HIDDEN[0])).astype(jnp.float32) * scale
    m2 = jax.random.bernoulli(k2, 1.0 - DROPOUT_P, (Bp, HIDDEN[1])).astype(jnp.float32) * scale
    m3 = jax.random.bernoulli(k3, 1.0 - DROPOUT_P, (Bp, HIDDEN[2])).astype(jnp.float32) * scale

    # bf16 weights / input for the MXU; pad x rows and W4/b4 class dim.
    xp = jnp.zeros((Bp, INPUT_SIZE), jnp.bfloat16).at[:B].set(x.astype(jnp.bfloat16))
    w1b = w1.astype(jnp.bfloat16)
    w2b = w2.astype(jnp.bfloat16)
    w3b = w3.astype(jnp.bfloat16)
    w4p = jnp.zeros((HIDDEN[2], PADDED_CLASSES), jnp.bfloat16
                    ).at[:, :NUM_CLASSES].set(w4.astype(jnp.bfloat16))
    b4p = jnp.zeros((1, PADDED_CLASSES), jnp.float32).at[:, :NUM_CLASSES].set(b4)

    def batch_spec(cols):          # tiled along the batch grid axis
        return pl.BlockSpec((TB, cols), lambda i: (i, 0))

    def resident(shape):           # VMEM-resident across all grid steps
        return pl.BlockSpec(shape, lambda i: (0, 0))

    flops = 2 * Bp * (INPUT_SIZE * HIDDEN[0] + HIDDEN[0] * HIDDEN[1]
                      + HIDDEN[1] * HIDDEN[2] + HIDDEN[2] * NUM_CLASSES)
    bytes_accessed = (xp.size * 2
                      + (m1.size + m2.size + m3.size) * 4
                      + Bp * PADDED_CLASSES * 4
                      + (w1b.size + w2b.size + w3b.size + w4p.size) * 2
                      + (b1.size + b2.size + b3.size + b4p.size) * 4)

    out = pl.pallas_call(
        _simple_fc_kernel,
        out_shape=jax.ShapeDtypeStruct((Bp, PADDED_CLASSES), jnp.float32),
        grid=(Bp // TB,),
        in_specs=[
            batch_spec(INPUT_SIZE),
            resident((INPUT_SIZE, HIDDEN[0])), resident((1, HIDDEN[0])), batch_spec(HIDDEN[0]),
            resident((HIDDEN[0], HIDDEN[1])), resident((1, HIDDEN[1])), batch_spec(HIDDEN[1]),
            resident((HIDDEN[1], HIDDEN[2])), resident((1, HIDDEN[2])), batch_spec(HIDDEN[2]),
            resident((HIDDEN[2], PADDED_CLASSES)), resident((1, PADDED_CLASSES)),
        ],
        out_specs=batch_spec(PADDED_CLASSES),
        compiler_params=pltpu.CompilerParams(
            dimension_semantics=("parallel",),      # megacore sharding on v7x
            vmem_limit_bytes=32 * 1024 * 1024),
        cost_estimate=pl.CostEstimate(flops=flops, transcendentals=0,
                                      bytes_accessed=bytes_accessed),
    )(xp,
      w1b, b1.reshape(1, -1), m1,
      w2b, b2.reshape(1, -1), m2,
      w3b, b3.reshape(1, -1), m3,
      w4p, b4p)

    return out[:B, :NUM_CLASSES]


def init_params(key):
    """Deterministic PyTorch-style init: U(-1/sqrt(fan_in), 1/sqrt(fan_in))."""
    dims = (INPUT_SIZE,) + HIDDEN + (NUM_CLASSES,)
    params = []
    for fan_in, fan_out in zip(dims[:-1], dims[1:]):
        key, kw, kb = jax.random.split(key, 3)
        bound = fan_in ** -0.5
        w = jax.random.uniform(kw, (fan_in, fan_out), dtype=jnp.float32,
                               minval=-bound, maxval=bound)
        b = jax.random.uniform(kb, (fan_out,), dtype=jnp.float32,
                               minval=-bound, maxval=bound)
        params += [w, b]
    return tuple(params)


if __name__ == "__main__":
    key = jax.random.PRNGKey(0)
    kx, kp, kd = jax.random.split(key, 3)

    B = 8
    x = jax.random.normal(kx, (B, INPUT_SIZE), dtype=jnp.float32)
    params = init_params(kp)

    out = simple_fc_forward(x, params, kd)
    jax.block_until_ready(out)
    assert out.shape == (B, NUM_CLASSES) and out.dtype == jnp.float32
    print("KERNEL_OK")
</pallas_src>

<mosaic_0001>
module attributes {stable_mosaic.version = 11 : i64} {
  func.func @_simple_fc_kernel(%arg0: i32, %arg1: memref<8x784xbf16, #tpu.memory_space<vmem>>, %arg2: memref<784x512xbf16, #tpu.memory_space<vmem>>, %arg3: memref<1x512xf32, #tpu.memory_space<vmem>>, %arg4: memref<8x512xf32, #tpu.memory_space<vmem>>, %arg5: memref<512x256xbf16, #tpu.memory_space<vmem>>, %arg6: memref<1x256xf32, #tpu.memory_space<vmem>>, %arg7: memref<8x256xf32, #tpu.memory_space<vmem>>, %arg8: memref<256x128xbf16, #tpu.memory_space<vmem>>, %arg9: memref<1x128xf32, #tpu.memory_space<vmem>>, %arg10: memref<8x128xf32, #tpu.memory_space<vmem>>, %arg11: memref<128x128xbf16, #tpu.memory_space<vmem>>, %arg12: memref<1x128xf32, #tpu.memory_space<vmem>>, %arg13: memref<8x128xf32, #tpu.memory_space<vmem>>) attributes {dimension_semantics = [#tpu.dimension_semantics<parallel>], iteration_bounds = array<i64: 1>, scalar_prefetch = 0 : i64, scratch_operands = 0 : i64, tpu.core_type = #tpu.core_type<tc>, window_params = [{transform_indices = @transform_0, window_bounds = array<i64: 8, 784>}, {pipeline_mode = #tpu.pipeline_mode<synchronous>, transform_indices = @transform_1, window_bounds = array<i64: 784, 512>}, {pipeline_mode = #tpu.pipeline_mode<synchronous>, transform_indices = @transform_2, window_bounds = array<i64: 1, 512>}, {transform_indices = @transform_3, window_bounds = array<i64: 8, 512>}, {pipeline_mode = #tpu.pipeline_mode<synchronous>, transform_indices = @transform_4, window_bounds = array<i64: 512, 256>}, {pipeline_mode = #tpu.pipeline_mode<synchronous>, transform_indices = @transform_5, window_bounds = array<i64: 1, 256>}, {transform_indices = @transform_6, window_bounds = array<i64: 8, 256>}, {pipeline_mode = #tpu.pipeline_mode<synchronous>, transform_indices = @transform_7, window_bounds = array<i64: 256, 128>}, {pipeline_mode = #tpu.pipeline_mode<synchronous>, transform_indices = @transform_8, window_bounds = array<i64: 1, 128>}, {transform_indices = @transform_9, window_bounds = array<i64: 8, 128>}, {pipeline_mode = #tpu.pipeline_mode<synchronous>, transform_indices = @transform_10, window_bounds = array<i64: 128, 128>}, {pipeline_mode = #tpu.pipeline_mode<synchronous>, transform_indices = @transform_11, window_bounds = array<i64: 1, 128>}, {transform_indices = @transform_12, window_bounds = array<i64: 8, 128>}]} {
    %c0 = arith.constant 0 : index
    %c0_0 = arith.constant 0 : index
    %0 = vector.load %arg1[%c0, %c0_0] : memref<8x784xbf16, #tpu.memory_space<vmem>>, vector<8x784xbf16>
    %c0_1 = arith.constant 0 : index
    %c0_2 = arith.constant 0 : index
    %1 = vector.load %arg2[%c0_1, %c0_2] : memref<784x512xbf16, #tpu.memory_space<vmem>>, vector<784x512xbf16>
    %cst = arith.constant dense<0.000000e+00> : vector<8x512xf32>
    %2 = tpu.matmul %0, %1, %cst {dimension_numbers = #tpu.dot_dimension_numbers<[1], [0], [0], [1], [0, 0, 1, 1], [], []>} : vector<8x784xbf16>, vector<784x512xbf16>, vector<8x512xf32> -> vector<8x512xf32>
    %c0_3 = arith.constant 0 : index
    %c0_4 = arith.constant 0 : index
    %3 = vector.load %arg3[%c0_3, %c0_4] : memref<1x512xf32, #tpu.memory_space<vmem>>, vector<1x512xf32>
    %4 = vector.broadcast %3 : vector<1x512xf32> to vector<8x512xf32>
    %5 = arith.addf %2, %4 : vector<8x512xf32>
    %cst_5 = arith.constant 0.000000e+00 : f32
    %6 = vector.broadcast %cst_5 : f32 to vector<8x512xf32>
    %7 = arith.maximumf %5, %6 : vector<8x512xf32>
    %c0_6 = arith.constant 0 : index
    %c0_7 = arith.constant 0 : index
    %8 = vector.load %arg4[%c0_6, %c0_7] : memref<8x512xf32, #tpu.memory_space<vmem>>, vector<8x512xf32>
    %9 = arith.mulf %7, %8 : vector<8x512xf32>
    %10 = arith.truncf %9 : vector<8x512xf32> to vector<8x512xbf16>
    %c0_8 = arith.constant 0 : index
    %c0_9 = arith.constant 0 : index
    %11 = vector.load %arg5[%c0_8, %c0_9] : memref<512x256xbf16, #tpu.memory_space<vmem>>, vector<512x256xbf16>
    %cst_10 = arith.constant dense<0.000000e+00> : vector<8x256xf32>
    %12 = tpu.matmul %10, %11, %cst_10 {dimension_numbers = #tpu.dot_dimension_numbers<[1], [0], [0], [1], [0, 0, 1, 1], [], []>} : vector<8x512xbf16>, vector<512x256xbf16>, vector<8x256xf32> -> vector<8x256xf32>
    %c0_11 = arith.constant 0 : index
    %c0_12 = arith.constant 0 : index
    %13 = vector.load %arg6[%c0_11, %c0_12] : memref<1x256xf32, #tpu.memory_space<vmem>>, vector<1x256xf32>
    %14 = vector.broadcast %13 : vector<1x256xf32> to vector<8x256xf32>
    %15 = arith.addf %12, %14 : vector<8x256xf32>
    %cst_13 = arith.constant 0.000000e+00 : f32
    %16 = vector.broadcast %cst_13 : f32 to vector<8x256xf32>
    %17 = arith.maximumf %15, %16 : vector<8x256xf32>
    %c0_14 = arith.constant 0 : index
    %c0_15 = arith.constant 0 : index
    %18 = vector.load %arg7[%c0_14, %c0_15] : memref<8x256xf32, #tpu.memory_space<vmem>>, vector<8x256xf32>
    %19 = arith.mulf %17, %18 : vector<8x256xf32>
    %20 = arith.truncf %19 : vector<8x256xf32> to vector<8x256xbf16>
    %c0_16 = arith.constant 0 : index
    %c0_17 = arith.constant 0 : index
    %21 = vector.load %arg8[%c0_16, %c0_17] : memref<256x128xbf16, #tpu.memory_space<vmem>>, vector<256x128xbf16>
    %cst_18 = arith.constant dense<0.000000e+00> : vector<8x128xf32>
    %22 = tpu.matmul %20, %21, %cst_18 {dimension_numbers = #tpu.dot_dimension_numbers<[1], [0], [0], [1], [0, 0, 1, 1], [], []>} : vector<8x256xbf16>, vector<256x128xbf16>, vector<8x128xf32> -> vector<8x128xf32>
    %c0_19 = arith.constant 0 : index
    %c0_20 = arith.constant 0 : index
    %23 = vector.load %arg9[%c0_19, %c0_20] : memref<1x128xf32, #tpu.memory_space<vmem>>, vector<1x128xf32>
    %24 = vector.broadcast %23 : vector<1x128xf32> to vector<8x128xf32>
    %25 = arith.addf %22, %24 : vector<8x128xf32>
    %cst_21 = arith.constant 0.000000e+00 : f32
    %26 = vector.broadcast %cst_21 : f32 to vector<8x128xf32>
    %27 = arith.maximumf %25, %26 : vector<8x128xf32>
    %c0_22 = arith.constant 0 : index
    %c0_23 = arith.constant 0 : index
    %28 = vector.load %arg10[%c0_22, %c0_23] : memref<8x128xf32, #tpu.memory_space<vmem>>, vector<8x128xf32>
    %29 = arith.mulf %27, %28 : vector<8x128xf32>
    %30 = arith.truncf %29 : vector<8x128xf32> to vector<8x128xbf16>
    %c0_24 = arith.constant 0 : index
    %c0_25 = arith.constant 0 : index
    %31 = vector.load %arg11[%c0_24, %c0_25] : memref<128x128xbf16, #tpu.memory_space<vmem>>, vector<128x128xbf16>
    %cst_26 = arith.constant dense<0.000000e+00> : vector<8x128xf32>
    %32 = tpu.matmul %30, %31, %cst_26 {dimension_numbers = #tpu.dot_dimension_numbers<[1], [0], [0], [1], [0, 0, 1, 1], [], []>} : vector<8x128xbf16>, vector<128x128xbf16>, vector<8x128xf32> -> vector<8x128xf32>
    %c0_27 = arith.constant 0 : index
    %c0_28 = arith.constant 0 : index
    %33 = vector.load %arg12[%c0_27, %c0_28] : memref<1x128xf32, #tpu.memory_space<vmem>>, vector<1x128xf32>
    %34 = vector.broadcast %33 : vector<1x128xf32> to vector<8x128xf32>
    %35 = arith.addf %32, %34 : vector<8x128xf32>
    %c0_29 = arith.constant 0 : index
    %c0_30 = arith.constant 0 : index
    %36 = vector.load %arg13[%c0_29, %c0_30] : memref<8x128xf32, #tpu.memory_space<vmem>>, vector<8x128xf32>
    tpu.vector_store %arg13[%c0_29, %c0_30], %35 {strides = array<i32>} : memref<8x128xf32, #tpu.memory_space<vmem>>, vector<8x128xf32>,
    return
  }
  func.func @transform_0(%arg0: i32) -> (i32, i32) {
    %c0_i32 = arith.constant 0 : i32
    %c0_i32_0 = arith.constant 0 : i32
    return %arg0, %c0_i32 : i32, i32
  }
  func.func @transform_1(%arg0: i32) -> (i32, i32) {
    %c0_i32 = arith.constant 0 : i32
    %c0_i32_0 = arith.constant 0 : i32
    %c0_i32_1 = arith.constant 0 : i32
    return %c0_i32, %c0_i32_0 : i32, i32
  }
  func.func @transform_2(%arg0: i32) -> (i32, i32) {
    %c0_i32 = arith.constant 0 : i32
    %c0_i32_0 = arith.constant 0 : i32
    %c0_i32_1 = arith.constant 0 : i32
    return %c0_i32, %c0_i32_0 : i32, i32
  }
  func.func @transform_3(%arg0: i32) -> (i32, i32) {
    %c0_i32 = arith.constant 0 : i32
    %c0_i32_0 = arith.constant 0 : i32
    return %arg0, %c0_i32 : i32, i32
  }
  func.func @transform_4(%arg0: i32) -> (i32, i32) {
    %c0_i32 = arith.constant 0 : i32
    %c0_i32_0 = arith.constant 0 : i32
    %c0_i32_1 = arith.constant 0 : i32
    return %c0_i32, %c0_i32_0 : i32, i32
  }
  func.func @transform_5(%arg0: i32) -> (i32, i32) {
    %c0_i32 = arith.constant 0 : i32
    %c0_i32_0 = arith.constant 0 : i32
    %c0_i32_1 = arith.constant 0 : i32
    return %c0_i32, %c0_i32_0 : i32, i32
  }
  func.func @transform_6(%arg0: i32) -> (i32, i32) {
    %c0_i32 = arith.constant 0 : i32
    %c0_i32_0 = arith.constant 0 : i32
    return %arg0, %c0_i32 : i32, i32
  }
  func.func @transform_7(%arg0: i32) -> (i32, i32) {
    %c0_i32 = arith.constant 0 : i32
    %c0_i32_0 = arith.constant 0 : i32
    %c0_i32_1 = arith.constant 0 : i32
    return %c0_i32, %c0_i32_0 : i32, i32
  }
  func.func @transform_8(%arg0: i32) -> (i32, i32) {
    %c0_i32 = arith.constant 0 : i32
    %c0_i32_0 = arith.constant 0 : i32
    %c0_i32_1 = arith.constant 0 : i32
    return %c0_i32, %c0_i32_0 : i32, i32
  }
  func.func @transform_9(%arg0: i32) -> (i32, i32) {
    %c0_i32 = arith.constant 0 : i32
    %c0_i32_0 = arith.constant 0 : i32
    return %arg0, %c0_i32 : i32, i32
  }
  func.func @transform_10(%arg0: i32) -> (i32, i32) {
    %c0_i32 = arith.constant 0 : i32
    %c0_i32_0 = arith.constant 0 : i32
    %c0_i32_1 = arith.constant 0 : i32
    return %c0_i32, %c0_i32_0 : i32, i32
  }
  func.func @transform_11(%arg0: i32) -> (i32, i32) {
    %c0_i32 = arith.constant 0 : i32
    %c0_i32_0 = arith.constant 0 : i32
    %c0_i32_1 = arith.constant 0 : i32
    return %c0_i32, %c0_i32_0 : i32, i32
  }
  func.func @transform_12(%arg0: i32) -> (i32, i32) {
    %c0_i32 = arith.constant 0 : i32
    %c0_i32_0 = arith.constant 0 : i32
    return %arg0, %c0_i32 : i32, i32
  }
}

</mosaic_0001>

<bundles_post_ra>
// kernel: simple_fc_forward.3
= control target key start
LH: loop header
LB: loop body
LE: loop exit
PB: predicated region body
PF: predicated region fallthrough
CT: control target
= control target key end

     0   :  { %vm1269_vm0 = vcmask 130048   ;;  %s4222_s0 = inlined_call_operand.vmem [shape: bf16[8,784], index: 0, kind: input, shape index: {}]   ;;  %s4223_s1 = inlined_call_operand.vmem [shape: bf16[784,512], index: 1, kind: input, shape index: {}]   ;;  %s4224_s2 = inlined_call_operand.vmem [shape: f32[1,512], index: 2, kind: input, shape index: {}]   ;;  %s4225_s3 = inlined_call_operand.vmem [shape: f32[8,512], index: 3, kind: input, shape index: {}]   ;;  %s4226_s4 = inlined_call_operand.vmem [shape: bf16[512,256], index: 4, kind: input, shape index: {}]   ;;  %s4227_s5 = inlined_call_operand.vmem [shape: f32[1,256], index: 5, kind: input, shape index: {}]   ;;  %s4228_s6 = inlined_call_operand.vmem [shape: f32[8,256], index: 6, kind: input, shape index: {}]   ;;  %s4229_s7 = inlined_call_operand.vmem [shape: bf16[256,128], index: 7, kind: input, shape index: {}]   ;;  %s4230_s8 = inlined_call_operand.vmem [shape: f32[1,128], index: 8, kind: input, shape index: {}]   ;;  %s4231_s9 = inlined_call_operand.vmem [shape: f32[8,128], index: 9, kind: input, shape index: {}]   ;;  %s4232_s10 = inlined_call_operand.vmem [shape: bf16[128,128], index: 10, kind: input, shape index: {}]   ;;  %s4233_s11 = inlined_call_operand.vmem [shape: f32[1,128], index: 11, kind: input, shape index: {}]   ;;  %s4234_s12 = inlined_call_operand.hbm [shape: f32[8,128], index: 12, kind: output, shape index: {}]  }
   0x1   :  { %v2758_v0 = vld [vmem:[%s4223_s1 + $0xe4] ss:$16 sps:$4 sm:$0xff]   ;;  %v2762_v2 = vld [vmem:[%s4223_s1 + $0xe0] ss:$16 sps:$4 sm:$0xff]   ;;  %v44_v48 = vld [vmem:[%s4222_s0 + $0x8] sm:$0xff] }
   0x2   :  { %v2760_v1 = vld [vmem:[%s4223_s1 + $0x2e4] ss:$16 sps:$4 sm:$0xff]   ;;  %1273 = vmatprep.subr.bf16.mxu0 %v2758_v0  ;;  %v2763_v3 = vld [vmem:[%s4223_s1 + $0x2e0] ss:$16 sps:$4 sm:$0xff]   ;;  %v3422_v51 = vcombine.high %v44_v48, %v44_v48 }
   0x3   :  { %1314 = vmatprep.subr.bf16.mxu1 %v2760_v1  ;;  %v2764_v4 = vld [vmem:[%s4223_s1 + $0xc4] ss:$16 sps:$4 sm:$0xff]   ;;  %1274 = vmatpush1.bf16.msra.mxu0 %v2762_v2  ;;  %v2768_v6 = vld [vmem:[%s4223_s1 + $0xc0] ss:$16 sps:$4 sm:$0xff]  }
   0x4   :  { %1315 = vmatpush1.bf16.msra.mxu1 %v2763_v3  ;;  %v2766_v5 = vld [vmem:[%s4223_s1 + $0x2c4] ss:$16 sps:$4 sm:$0xff]   ;;  %1275 = vmatprep.subr.bf16.mxu0 %v2764_v4  ;;  %v2769_v7 = vld [vmem:[%s4223_s1 + $0x2c0] ss:$16 sps:$4 sm:$0xff]  }
   0x5   :  { %1316 = vmatprep.subr.bf16.mxu1 %v2766_v5  ;;  %v2770_v8 = vld [vmem:[%s4223_s1 + $0xa4] ss:$16 sps:$4 sm:$0xff]   ;;  %v2774_v10 = vld [vmem:[%s4223_s1 + $0xa0] ss:$16 sps:$4 sm:$0xff]   ;;  %1346 = vmatprep.mubr.bf16.mxu1 %v3422_v51 }
   0x6   :  { %v2772_v9 = vld [vmem:[%s4223_s1 + $0x2a4] ss:$16 sps:$4 sm:$0xff]   ;;  %v2775_v11 = vld [vmem:[%s4223_s1 + $0x2a0] ss:$16 sps:$4 sm:$0xff]  }
   0x7   :  { %1276 = vmatpush1.bf16.msra.mxu0 %v2768_v6  ;;  %v2776_v12 = vld [vmem:[%s4223_s1 + $0x84] ss:$16 sps:$4 sm:$0xff]   ;;  %v2780_v14 = vld [vmem:[%s4223_s1 + $0x80] ss:$16 sps:$4 sm:$0xff]  }
   0x8   :  { %1317 = vmatpush1.bf16.msra.mxu1 %v2769_v7  ;;  %1277 = vmatprep.subr.bf16.mxu0 %v2770_v8  ;;  %v2778_v13 = vld [vmem:[%s4223_s1 + $0x284] ss:$16 sps:$4 sm:$0xff]   ;;  %v2781_v15 = vld [vmem:[%s4223_s1 + $0x280] ss:$16 sps:$4 sm:$0xff]   ;;  %v3482_v7 = vcombine.low %v44_v48, %v44_v48  ;;  %v2918_v48 = vld [vmem:[%s4223_s1 + $0x1ec] ss:$16 sps:$4 sm:$0xff]  }
   0x9   :  { %1318 = vmatprep.subr.bf16.mxu1 %v2772_v9  ;;  %v2782_v16 = vld [vmem:[%s4223_s1 + $0x64] ss:$16 sps:$4 sm:$0xff]   ;;  %v2786_v18 = vld [vmem:[%s4223_s1 + $0x60] ss:$16 sps:$4 sm:$0xff]  }
   0xa   :  { %v2784_v17 = vld [vmem:[%s4223_s1 + $0x264] ss:$16 sps:$4 sm:$0xff]   ;;  %v2787_v19 = vld [vmem:[%s4223_s1 + $0x260] ss:$16 sps:$4 sm:$0xff]  }
   0xb   :  { %1278 = vmatpush1.bf16.msra.mxu0 %v2774_v10  ;;  %v2788_v20 = vld [vmem:[%s4223_s1 + $0x44] ss:$16 sps:$4 sm:$0xff]   ;;  %v2792_v22 = vld [vmem:[%s4223_s1 + $0x40] ss:$16 sps:$4 sm:$0xff]  }
   0xc   :  { %1319 = vmatpush1.bf16.msra.mxu1 %v2775_v11  ;;  %1279 = vmatprep.subr.bf16.mxu0 %v2776_v12  ;;  %v2790_v21 = vld [vmem:[%s4223_s1 + $0x244] ss:$16 sps:$4 sm:$0xff]   ;;  %v2793_v23 = vld [vmem:[%s4223_s1 + $0x240] ss:$16 sps:$4 sm:$0xff]   ;;  %v2869_v11 = vld [vmem:[%s4223_s1 + $0xec] ss:$16 sps:$4 sm:$0xff]  }
   0xd   :  { %1320 = vmatprep.subr.bf16.mxu1 %v2778_v13  ;;  %v2794_v24 = vld [vmem:[%s4223_s1 + $0x24] ss:$16 sps:$4 sm:$0xff]   ;;  %v2798_v26 = vld [vmem:[%s4223_s1 + $0x20] ss:$16 sps:$4 sm:$0xff]   ;;  %v3201_v13 = vmov 0  }
   0xe   :  { %v2796_v25 = vld [vmem:[%s4223_s1 + $0x224] ss:$16 sps:$4 sm:$0xff]   ;;  %v2799_v27 = vld [vmem:[%s4223_s1 + $0x220] ss:$16 sps:$4 sm:$0xff]  }
   0xf   :  { %1280 = vmatpush1.bf16.msra.mxu0 %v2780_v14  ;;  %v2800_v28 = vld [vmem:[%s4223_s1 + $0x4] ss:$16 sps:$4 sm:$0xff]   ;;  %v2804_v30 = vld [vmem:[%s4223_s1] ss:$16 sps:$4 sm:$0xff]  }
  0x10   :  { %1321 = vmatpush1.bf16.msra.mxu1 %v2781_v15  ;;  %1281 = vmatprep.subr.bf16.mxu0 %v2782_v16  ;;  %v2802_v29 = vld [vmem:[%s4223_s1 + $0x204] ss:$16 sps:$4 sm:$0xff]   ;;  %v2805_v31 = vld [vmem:[%s4223_s1 + $0x200] ss:$16 sps:$4 sm:$0xff]   ;;  %v2867_v15 = vld [vmem:[%s4223_s1 + $0xe8] ss:$16 sps:$4 sm:$0xff]  }
  0x11   :  { %1322 = vmatprep.subr.bf16.mxu1 %v2784_v17  ;;  %v2806_v32 = vld [vmem:[%s4223_s1 + $0x1e4] ss:$16 sps:$4 sm:$0xff]   ;;  %v2810_v34 = vld [vmem:[%s4223_s1 + $0x1e0] ss:$16 sps:$4 sm:$0xff]   ;;  %v3514_v17 = vld [vmem:[%s4222_s0 + $0x18] ss:$0 sps:$4 sm:$0xff]  }
  0x12   :  { %v2808_v33 = vld [vmem:[%s4223_s1 + $0x3e4] ss:$16 sps:$4 sm:$0xff]   ;;  %v2811_v35 = vld [vmem:[%s4223_s1 + $0x3e0] ss:$16 sps:$4 sm:$0xff]  }
  0x13   :  { %1282 = vmatpush1.bf16.msra.mxu0 %v2786_v18  ;;  %v2812_v36 = vld [vmem:[%s4223_s1 + $0x1c4] ss:$16 sps:$4 sm:$0xff]   ;;  %v2816_v38 = vld [vmem:[%s4223_s1 + $0x1c0] ss:$16 sps:$4 sm:$0xff]   ;;  %v2876_v18 = vld [vmem:[%s4223_s1 + $0xcc] ss:$16 sps:$4 sm:$0xff]  }
  0x14   :  { %1323 = vmatpush1.bf16.msra.mxu1 %v2787_v19  ;;  %1283 = vmatprep.subr.bf16.mxu0 %v2788_v20  ;;  %v2814_v37 = vld [vmem:[%s4223_s1 + $0x3c4] ss:$16 sps:$4 sm:$0xff]   ;;  %v2817_v39 = vld [vmem:[%s4223_s1 + $0x3c0] ss:$16 sps:$4 sm:$0xff]   ;;  %v2874_v20 = vld [vmem:[%s4223_s1 + $0xc8] ss:$16 sps:$4 sm:$0xff]  }
  0x15   :  { %1324 = vmatprep.subr.bf16.mxu1 %v2790_v21  ;;  %v2818_v40 = vld [vmem:[%s4223_s1 + $0x1a4] ss:$16 sps:$4 sm:$0xff]   ;;  %v2822_v42 = vld [vmem:[%s4223_s1 + $0x1a0] ss:$16 sps:$4 sm:$0xff]  }
  0x16   :  { %v2820_v41 = vld [vmem:[%s4223_s1 + $0x3a4] ss:$16 sps:$4 sm:$0xff]   ;;  %v2823_v43 = vld [vmem:[%s4223_s1 + $0x3a0] ss:$16 sps:$4 sm:$0xff]  }
  0x17   :  { %1284 = vmatpush1.bf16.msra.mxu0 %v2792_v22  ;;  %v2824_v44 = vld [vmem:[%s4223_s1 + $0x184] ss:$16 sps:$4 sm:$0xff]   ;;  %v2828_v49 = vld [vmem:[%s4223_s1 + $0x180] ss:$16 sps:$4 sm:$0xff]   ;;  %v2882_v22 = vld [vmem:[%s4223_s1 + $0xac] ss:$16 sps:$4 sm:$0xff]  }
  0x18   :  { %1325 = vmatpush1.bf16.msra.mxu1 %v2793_v23  ;;  %1285 = vmatprep.subr.bf16.mxu0 %v2794_v24  ;;  %v2826_v45 = vld [vmem:[%s4223_s1 + $0x384] ss:$16 sps:$4 sm:$0xff]   ;;  %v2829_v50 = vld [vmem:[%s4223_s1 + $0x380] ss:$16 sps:$4 sm:$0xff]   ;;  %v2880_v24 = vld [vmem:[%s4223_s1 + $0xa8] ss:$16 sps:$4 sm:$0xff]  }
  0x19   :  { %1326 = vmatprep.subr.bf16.mxu1 %v2796_v25  ;;  %v43_v46 = vld [vmem:[%s4222_s0] sm:$0xff] }
  0x1a   :  { %v3411_v47 = vcombine.high %v43_v46, %v43_v46  ;;  %v2830_v52 = vld [vmem:[%s4223_s1 + $0x164] ss:$16 sps:$4 sm:$0xff]   ;;  %v2834_v54 = vld [vmem:[%s4223_s1 + $0x160] ss:$16 sps:$4 sm:$0xff]   ;;  %v3480_v6 = vcombine.low %v43_v46, %v43_v46  ;;  %v2910_v46 = vld [vmem:[%s4223_s1 + $0x8] ss:$16 sps:$4 sm:$0xff]  }
  0x1b   :  { %1286 = vmatpush1.bf16.msra.mxu0 %v2798_v26  ;;  %v2832_v53 = vld [vmem:[%s4223_s1 + $0x364] ss:$16 sps:$4 sm:$0xff]   ;;  %v2835_v55 = vld [vmem:[%s4223_s1 + $0x360] ss:$16 sps:$4 sm:$0xff]   ;;  %v2888_v26 = vld [vmem:[%s4223_s1 + $0x8c] ss:$16 sps:$4 sm:$0xff]  }
  0x1c   :  { %1327 = vmatpush1.bf16.msra.mxu1 %v2799_v27  ;;  %1287 = vmatprep.subr.bf16.mxu0 %v2800_v28  ;;  %v2836_v56 = vld [vmem:[%s4223_s1 + $0x144] ss:$16 sps:$4 sm:$0xff]   ;;  %v2840_v58 = vld [vmem:[%s4223_s1 + $0x140] ss:$16 sps:$4 sm:$0xff]   ;;  %v2886_v28 = vld [vmem:[%s4223_s1 + $0x88] ss:$16 sps:$4 sm:$0xff]  }
  0x1d   :  { %1328 = vmatprep.subr.bf16.mxu1 %v2802_v29  ;;  %1305 = vmatprep.mubr.bf16.mxu0 %v3411_v47  ;;  %v2838_v57 = vld [vmem:[%s4223_s1 + $0x344] ss:$16 sps:$4 sm:$0xff]   ;;  %v2841_v59 = vld [vmem:[%s4223_s1 + $0x340] ss:$16 sps:$4 sm:$0xff]  }
  0x1e   :  { %v2842_v60 = vld [vmem:[%s4223_s1 + $0x124] ss:$16 sps:$4 sm:$0xff]   ;;  %v2846_v62 = vld [vmem:[%s4223_s1 + $0x120] ss:$16 sps:$4 sm:$0xff]  }
  0x1f   :  { %1288 = vmatpush1.bf16.msra.mxu0 %v2804_v30  ;;  %v2844_v61 = vld [vmem:[%s4223_s1 + $0x324] ss:$16 sps:$4 sm:$0xff]   ;;  %v2847_v63 = vld [vmem:[%s4223_s1 + $0x320] ss:$16 sps:$4 sm:$0xff]   ;;  %v2894_v30 = vld [vmem:[%s4223_s1 + $0x6c] ss:$16 sps:$4 sm:$0xff]  }
  0x20   :  { %1329 = vmatpush1.bf16.msra.mxu1 %v2805_v31  ;;  %1289 = vmatprep.subr.bf16.mxu0 %v2806_v32  ;;  %v2848_v0 = vld [vmem:[%s4223_s1 + $0x104] ss:$16 sps:$4 sm:$0xff]   ;;  %v2852_v2 = vld [vmem:[%s4223_s1 + $0x100] ss:$16 sps:$4 sm:$0xff]  }
  0x21   :  { %1330 = vmatprep.subr.bf16.mxu1 %v2808_v33  ;;  %v2850_v1 = vld [vmem:[%s4223_s1 + $0x304] ss:$16 sps:$4 sm:$0xff]   ;;  %v2853_v3 = vld [vmem:[%s4223_s1 + $0x300] ss:$16 sps:$4 sm:$0xff]  }
  0x22   :  { %v2860_v4 = vld [vmem:[%s4223_s1 + $0x4e4] ss:$16 sps:$4 sm:$0xff]   ;;  %v2858_v8 = vld [vmem:[%s4223_s1 + $0x4e0] ss:$16 sps:$4 sm:$0xff]  }
  0x23   :  { %1290 = vmatpush2.bf16.msra.mxu0 %v2810_v34  ;;  %v2863_v5 = vld [vmem:[%s4223_s1 + $0x604] ss:$16 sps:$4 sm:$0xff]   ;;  %v2861_v9 = vld [vmem:[%s4223_s1 + $0x600] ss:$16 sps:$4 sm:$0xff]   ;;  %v2892_v34 = vld [vmem:[%s4223_s1 + $0x68] ss:$16 sps:$4 sm:$0xff]  }
  0x24   :  { %1331 = vmatpush2.bf16.msra.mxu1 %v2811_v35  ;;  %1291 = vmatprep.subr.bf16.mxu0 %v2812_v36  ;;  %v2866_v10 = vld [vmem:[%s4223_s1 + $0x4c4] ss:$16 sps:$4 sm:$0xff]   ;;  %v2864_v12 = vld [vmem:[%s4223_s1 + $0x4c0] ss:$16 sps:$4 sm:$0xff]   ;;  %v2900_v36 = vld [vmem:[%s4223_s1 + $0x4c] ss:$16 sps:$4 sm:$0xff]  }
  0x25   :  { %1332 = vmatprep.subr.bf16.mxu1 %v2814_v37  ;;  %v2872_v14 = vld [vmem:[%s4223_s1 + $0x4a4] ss:$16 sps:$4 sm:$0xff]   ;;  %v2870_v16 = vld [vmem:[%s4223_s1 + $0x4a0] ss:$16 sps:$4 sm:$0xff]  }
  0x26   :  { %v2879_v19 = vld [vmem:[%s4223_s1 + $0x484] ss:$16 sps:$4 sm:$0xff]   ;;  %v2877_v21 = vld [vmem:[%s4223_s1 + $0x480] ss:$16 sps:$4 sm:$0xff]  }
  0x27   :  { %1292 = vmatpush2.bf16.msra.mxu0 %v2816_v38  ;;  %v2885_v23 = vld [vmem:[%s4223_s1 + $0x464] ss:$16 sps:$4 sm:$0xff]   ;;  %v2883_v25 = vld [vmem:[%s4223_s1 + $0x460] ss:$16 sps:$4 sm:$0xff]   ;;  %v2898_v38 = vld [vmem:[%s4223_s1 + $0x48] ss:$16 sps:$4 sm:$0xff]  }
  0x28   :  { %1333 = vmatpush2.bf16.msra.mxu1 %v2817_v39  ;;  %1293 = vmatprep.subr.bf16.mxu0 %v2818_v40  ;;  %v2891_v27 = vld [vmem:[%s4223_s1 + $0x444] ss:$16 sps:$4 sm:$0xff]   ;;  %v2889_v29 = vld [vmem:[%s4223_s1 + $0x440] ss:$16 sps:$4 sm:$0xff]   ;;  %v2906_v40 = vld [vmem:[%s4223_s1 + $0x2c] ss:$16 sps:$4 sm:$0xff]  }
  0x29   :  { %1334 = vmatprep.subr.bf16.mxu1 %v2820_v41  ;;  %v2897_v31 = vld [vmem:[%s4223_s1 + $0x424] ss:$16 sps:$4 sm:$0xff]   ;;  %v2895_v35 = vld [vmem:[%s4223_s1 + $0x420] ss:$16 sps:$4 sm:$0xff]  }
  0x2a   :  { %v3564_v32 = vld [vmem:[%s4222_s0 + $0x10] sm:$0xff] }
  0x2b   :  { %1294 = vmatpush2.bf16.msra.mxu0 %v2822_v42  ;;  %v3568_v33 = vcombine.high %v3564_v32, %v3564_v32  ;;  %v2903_v37 = vld [vmem:[%s4223_s1 + $0x404] ss:$16 sps:$4 sm:$0xff]   ;;  %v2901_v39 = vld [vmem:[%s4223_s1 + $0x400] ss:$16 sps:$4 sm:$0xff]   ;;  %v2904_v42 = vld [vmem:[%s4223_s1 + $0x28] ss:$16 sps:$4 sm:$0xff]  }
  0x2c   :  { %1335 = vmatpush2.bf16.msra.mxu1 %v2823_v43  ;;  %1295 = vmatprep.subr.bf16.mxu0 %v2824_v44  ;;  %v2909_v41 = vld [vmem:[%s4223_s1 + $0x5e4] ss:$16 sps:$4 sm:$0xff]   ;;  %v2907_v43 = vld [vmem:[%s4223_s1 + $0x5e0] ss:$16 sps:$4 sm:$0xff]   ;;  %v2912_v44 = vld [vmem:[%s4223_s1 + $0xc] ss:$16 sps:$4 sm:$0xff]  }
  0x2d   :  { %1336 = vmatprep.subr.bf16.mxu1 %v2826_v45  ;;  %v2915_v45 = vld [vmem:[%s4223_s1 + $0x5c4] ss:$16 sps:$4 sm:$0xff]  }
  0x2f   :  { %1296 = vmatpush2.bf16.msra.mxu0 %v2828_v49  ;;  %v2921_v49 = vld [vmem:[%s4223_s1 + $0x5a4] ss:$16 sps:$4 sm:$0xff]  }
  0x30   :  { %1337 = vmatpush2.bf16.msra.mxu1 %v2829_v50  ;;  %1297 = vmatprep.subr.bf16.mxu0 %v2830_v52  ;;  %v2916_v50 = vld [vmem:[%s4223_s1 + $0x1e8] ss:$16 sps:$4 sm:$0xff]   ;;  %v2919_v52 = vld [vmem:[%s4223_s1 + $0x5a0] ss:$16 sps:$4 sm:$0xff]  }
  0x31   :  { %1338 = vmatprep.subr.bf16.mxu1 %v2832_v53  ;;  %v2924_v53 = vld [vmem:[%s4223_s1 + $0x1cc] ss:$16 sps:$4 sm:$0xff]  }
  0x33   :  { %1298 = vmatpush2.bf16.msra.mxu0 %v2834_v54  ;;  %v2927_v54 = vld [vmem:[%s4223_s1 + $0x584] ss:$16 sps:$4 sm:$0xff]  }
  0x34   :  { %1339 = vmatpush2.bf16.msra.mxu1 %v2835_v55  ;;  %1299 = vmatprep.subr.bf16.mxu0 %v2836_v56  ;;  %v2922_v55 = vld [vmem:[%s4223_s1 + $0x1c8] ss:$16 sps:$4 sm:$0xff]   ;;  %v2925_v56 = vld [vmem:[%s4223_s1 + $0x580] ss:$16 sps:$4 sm:$0xff]  }
  0x35   :  { %1340 = vmatprep.subr.bf16.mxu1 %v2838_v57  ;;  %v2930_v57 = vld [vmem:[%s4223_s1 + $0x1ac] ss:$16 sps:$4 sm:$0xff]  }
  0x37   :  { %1300 = vmatpush2.bf16.msra.mxu0 %v2840_v58  ;;  %v2933_v58 = vld [vmem:[%s4223_s1 + $0x564] ss:$16 sps:$4 sm:$0xff]  }
  0x38   :  { %1341 = vmatpush2.bf16.msra.mxu1 %v2841_v59  ;;  %1301 = vmatprep.subr.bf16.mxu0 %v2842_v60  ;;  %v2928_v59 = vld [vmem:[%s4223_s1 + $0x1a8] ss:$16 sps:$4 sm:$0xff]   ;;  %v2931_v60 = vld [vmem:[%s4223_s1 + $0x560] ss:$16 sps:$4 sm:$0xff]  }
  0x39   :  { %1342 = vmatprep.subr.bf16.mxu1 %v2844_v61  ;;  %v2936_v61 = vld [vmem:[%s4223_s1 + $0x18c] ss:$16 sps:$4 sm:$0xff]  }
  0x3b   :  { %1302 = vmatpush2.bf16.msra.mxu0 %v2846_v62  ;;  %v2939_v62 = vld [vmem:[%s4223_s1 + $0x544] ss:$16 sps:$4 sm:$0xff]  }
  0x3c   :  { %1343 = vmatpush2.bf16.msra.mxu1 %v2847_v63  ;;  %1303 = vmatprep.subr.bf16.mxu0 %v2848_v0  ;;  %v2934_v63 = vld [vmem:[%s4223_s1 + $0x188] ss:$16 sps:$4 sm:$0xff]   ;;  %v2937_v0 = vld [vmem:[%s4223_s1 + $0x540] ss:$16 sps:$4 sm:$0xff]  }
  0x3d   :  { %1344 = vmatprep.subr.bf16.mxu1 %v2850_v1  ;;  %v2942_v1 = vld [vmem:[%s4223_s1 + $0x16c] ss:$16 sps:$4 sm:$0xff]  }
  0x3f   :  { %1304 = vmatpush2.bf16.msra.mxu0 %v2852_v2  ;;  %v2945_v2 = vld [vmem:[%s4223_s1 + $0x524] ss:$16 sps:$4 sm:$0xff]  }
  0x40   :  { %1345 = vmatpush2.bf16.msra.mxu1 %v2853_v3  ;;  %1355 = vmatprep.subr.bf16.mxu0 %v2860_v4  ;;  %v2940_v3 = vld [vmem:[%s4223_s1 + $0x168] ss:$16 sps:$4 sm:$0xff]   ;;  %v2943_v4 = vld [vmem:[%s4223_s1 + $0x520] ss:$16 sps:$4 sm:$0xff]  }
  0x41   :  { %1410 = vmatprep.subr.bf16.mxu1 %v2863_v5  ;;  %v2948_v5 = vld [vmem:[%s4223_s1 + $0x14c] ss:$16 sps:$4 sm:$0xff]  }
  0x42   :  { %1306 = vmatmul.mubr.bf16.vlgmr.msra.gmra.mxu0 %v3480_v6 }
  0x43   :  { %1347 = vmatmul.mubr.bf16.vlgmr.msra.gmra.mxu1 %v3482_v7  ;;  %1356 = vmatpush1.bf16.msra.mxu0 %v2858_v8  ;;  %v2951_v8 = vld [vmem:[%s4223_s1 + $0x504] ss:$16 sps:$4 sm:$0xff]  }
  0x44   :  { %1411 = vmatpush1.bf16.msra.mxu1 %v2861_v9  ;;  %1357 = vmatprep.subr.bf16.mxu0 %v2866_v10  ;;  %v2946_v9 = vld [vmem:[%s4223_s1 + $0x148] ss:$16 sps:$4 sm:$0xff]   ;;  %v2949_v10 = vld [vmem:[%s4223_s1 + $0x500] ss:$16 sps:$4 sm:$0xff]  }
  0x45   :  { %1428 = vmatprep.mubr.bf16.mxu1 %v3201_v13  ;;  %1437 = vmatprep.subr.bf16.mxu1 %v2869_v11  ;;  %v2956_v11 = vld [vmem:[%s4223_s1 + $0x12c] ss:$16 sps:$4 sm:$0xff]  }
  0x46   :  { %1387 = vmatprep.mubr.bf16.mxu0 %v3568_v33 }
  0x47   :  { %1358 = vmatpush1.bf16.msra.mxu0 %v2864_v12  ;;  %v2959_v12 = vld [vmem:[%s4223_s1 + $0x2ec] ss:$16 sps:$4 sm:$0xff]  }
  0x48   :  { %1359 = vmatprep.subr.bf16.mxu0 %v2872_v14  ;;  %v3693_v14 = vcombine.low %v3564_v32, %v3564_v32  ;;  %v2986_v32 = vld [vmem:[%s4223_s1 + $0x48c] ss:$16 sps:$4 sm:$0xff]  }
  0x4b   :  { %2611 = vmatmul.mubr.msk.bf16.vlgmr.msra.gmra.mxu1 %vm1269_vm0, %v3514_v17  ;;  %1360 = vmatpush1.bf16.msra.mxu0 %v2870_v16  ;;  %v2957_v16 = vld [vmem:[%s4223_s1 + $0x2e8] ss:$16 sps:$4 sm:$0xff]  }
  0x4c   :  { %1438 = vmatpush1.bf16.msra.mxu1 %v2867_v15  ;;  %1361 = vmatprep.subr.bf16.mxu0 %v2879_v19  ;;  %v2954_v15 = vld [vmem:[%s4223_s1 + $0x128] ss:$16 sps:$4 sm:$0xff]   ;;  %v2965_v19 = vld [vmem:[%s4223_s1 + $0x2cc] ss:$16 sps:$4 sm:$0xff]  }
  0x4d   :  { %1439 = vmatprep.subr.bf16.mxu1 %v2876_v18  ;;  %1469 = vmatprep.mubr.bf16.mxu1 %v3411_v47  ;;  %v2913_v47 = vld [vmem:[%s4223_s1 + $0x5c0] ss:$16 sps:$4 sm:$0xff]   ;;  %v2962_v18 = vld [vmem:[%s4223_s1 + $0x10c] ss:$16 sps:$4 sm:$0xff]  }
  0x4f   :  { %1362 = vmatpush1.bf16.msra.mxu0 %v2877_v21  ;;  %v2963_v21 = vld [vmem:[%s4223_s1 + $0x2c8] ss:$16 sps:$4 sm:$0xff]  }
  0x50   :  { %1440 = vmatpush1.bf16.msra.mxu1 %v2874_v20  ;;  %1363 = vmatprep.subr.bf16.mxu0 %v2885_v23  ;;  %v2960_v20 = vld [vmem:[%s4223_s1 + $0x108] ss:$16 sps:$4 sm:$0xff]   ;;  %v2971_v23 = vld [vmem:[%s4223_s1 + $0x2ac] ss:$16 sps:$4 sm:$0xff]  }
  0x51   :  { %1441 = vmatprep.subr.bf16.mxu1 %v2882_v22  ;;  %v2968_v22 = vld [vmem:[%s4223_s1 + $0x4ec] ss:$16 sps:$4 sm:$0xff]  }
  0x53   :  { %1364 = vmatpush1.bf16.msra.mxu0 %v2883_v25  ;;  %v2969_v25 = vld [vmem:[%s4223_s1 + $0x2a8] ss:$16 sps:$4 sm:$0xff]  }
  0x54   :  { %1442 = vmatpush1.bf16.msra.mxu1 %v2880_v24  ;;  %1365 = vmatprep.subr.bf16.mxu0 %v2891_v27  ;;  %v2966_v24 = vld [vmem:[%s4223_s1 + $0x4e8] ss:$16 sps:$4 sm:$0xff]   ;;  %v2977_v27 = vld [vmem:[%s4223_s1 + $0x28c] ss:$16 sps:$4 sm:$0xff]  }
  0x55   :  { %1443 = vmatprep.subr.bf16.mxu1 %v2888_v26  ;;  %v2974_v26 = vld [vmem:[%s4223_s1 + $0x4cc] ss:$16 sps:$4 sm:$0xff]  }
  0x57   :  { %1366 = vmatpush1.bf16.msra.mxu0 %v2889_v29  ;;  %v2980_v29 = vld [vmem:[%s4223_s1 + $0x4ac] ss:$16 sps:$4 sm:$0xff]  }
  0x58   :  { %1444 = vmatpush1.bf16.msra.mxu1 %v2886_v28  ;;  %1367 = vmatprep.subr.bf16.mxu0 %v2897_v31  ;;  %v2972_v28 = vld [vmem:[%s4223_s1 + $0x4c8] ss:$16 sps:$4 sm:$0xff]  }
  0x59   :  { %1445 = vmatprep.subr.bf16.mxu1 %v2894_v30  ;;  %v2983_v30 = vld [vmem:[%s4223_s1 + $0x26c] ss:$16 sps:$4 sm:$0xff]   ;;  %v2978_v31 = vld [vmem:[%s4223_s1 + $0x4a8] ss:$16 sps:$4 sm:$0xff]  }
  0x5b   :  { %1368 = vmatpush1.bf16.msra.mxu0 %v2895_v35  ;;  %v2987_v35 = vld [vmem:[%s4223_s1 + $0x248] ss:$16 sps:$4 sm:$0xff]  }
  0x5c   :  { %1446 = vmatpush1.bf16.msra.mxu1 %v2892_v34  ;;  %1369 = vmatprep.subr.bf16.mxu0 %v2903_v37  ;;  %v2989_v34 = vld [vmem:[%s4223_s1 + $0x24c] ss:$16 sps:$4 sm:$0xff]  }
  0x5d   :  { %1447 = vmatprep.subr.bf16.mxu1 %v2900_v36  ;;  %v2992_v36 = vld [vmem:[%s4223_s1 + $0x46c] ss:$16 sps:$4 sm:$0xff]  }
  0x5e   :  { %v2995_v37 = vld [vmem:[%s4223_s1 + $0x22c] ss:$16 sps:$4 sm:$0xff]  }
  0x5f   :  { %1370 = vmatpush1.bf16.msra.mxu0 %v2901_v39  ;;  %v2993_v39 = vld [vmem:[%s4223_s1 + $0x228] ss:$16 sps:$4 sm:$0xff]  }
  0x60   :  { %1448 = vmatpush1.bf16.msra.mxu1 %v2898_v38  ;;  %1371 = vmatprep.subr.bf16.mxu0 %v2909_v41  ;;  %v2990_v38 = vld [vmem:[%s4223_s1 + $0x468] ss:$16 sps:$4 sm:$0xff]   ;;  %v3001_v41 = vld [vmem:[%s4223_s1 + $0x20c] ss:$16 sps:$4 sm:$0xff]  }
  0x61   :  { %1449 = vmatprep.subr.bf16.mxu1 %v2906_v40  ;;  %v2998_v40 = vld [vmem:[%s4223_s1 + $0x44c] ss:$16 sps:$4 sm:$0xff]  }
  0x63   :  { %1372 = vmatpush2.bf16.msra.mxu0 %v2907_v43  ;;  %v2999_v43 = vld [vmem:[%s4223_s1 + $0x208] ss:$16 sps:$4 sm:$0xff]  }
  0x64   :  { %1450 = vmatpush1.bf16.msra.mxu1 %v2904_v42  ;;  %1373 = vmatprep.subr.bf16.mxu0 %v2915_v45  ;;  %v2996_v42 = vld [vmem:[%s4223_s1 + $0x448] ss:$16 sps:$4 sm:$0xff]   ;;  %v3007_v45 = vld [vmem:[%s4223_s1 + $0x3ec] ss:$16 sps:$4 sm:$0xff]  }
  0x65   :  { %1451 = vmatprep.subr.bf16.mxu1 %v2912_v44  ;;  %v3004_v44 = vld [vmem:[%s4223_s1 + $0x42c] ss:$16 sps:$4 sm:$0xff]  }
  0x67   :  { %1374 = vmatpush2.bf16.msra.mxu0 %v2913_v47  ;;  %v3005_v47 = vld [vmem:[%s4223_s1 + $0x3e8] ss:$16 sps:$4 sm:$0xff]  }
  0x68   :  { %1452 = vmatpush1.bf16.msra.mxu1 %v2910_v46  ;;  %1375 = vmatprep.subr.bf16.mxu0 %v2921_v49  ;;  %v3002_v46 = vld [vmem:[%s4223_s1 + $0x428] ss:$16 sps:$4 sm:$0xff]   ;;  %v3013_v49 = vld [vmem:[%s4223_s1 + $0x3cc] ss:$16 sps:$4 sm:$0xff]  }
  0x69   :  { %1453 = vmatprep.subr.bf16.mxu1 %v2918_v48  ;;  %v3010_v48 = vld [vmem:[%s4223_s1 + $0x40c] ss:$16 sps:$4 sm:$0xff]  }
  0x6b   :  { %1376 = vmatpush2.bf16.msra.mxu0 %v2919_v52  ;;  %v3011_v52 = vld [vmem:[%s4223_s1 + $0x3c8] ss:$16 sps:$4 sm:$0xff]  }
  0x6c   :  { %1454 = vmatpush2.bf16.msra.mxu1 %v2916_v50  ;;  %1377 = vmatprep.subr.bf16.mxu0 %v2927_v54  ;;  %v3008_v50 = vld [vmem:[%s4223_s1 + $0x408] ss:$16 sps:$4 sm:$0xff]   ;;  %v3019_v54 = vld [vmem:[%s4223_s1 + $0x3ac] ss:$16 sps:$4 sm:$0xff]  }
  0x6d   :  { %1455 = vmatprep.subr.bf16.mxu1 %v2924_v53  ;;  %v3016_v53 = vld [vmem:[%s4223_s1 + $0x5ec] ss:$16 sps:$4 sm:$0xff]  }
  0x6f   :  { %1378 = vmatpush2.bf16.msra.mxu0 %v2925_v56  ;;  %v3017_v56 = vld [vmem:[%s4223_s1 + $0x3a8] ss:$16 sps:$4 sm:$0xff]  }
  0x70   :  { %1456 = vmatpush2.bf16.msra.mxu1 %v2922_v55  ;;  %1379 = vmatprep.subr.bf16.mxu0 %v2933_v58  ;;  %v3014_v55 = vld [vmem:[%s4223_s1 + $0x5e8] ss:$16 sps:$4 sm:$0xff]   ;;  %v3025_v58 = vld [vmem:[%s4223_s1 + $0x38c] ss:$16 sps:$4 sm:$0xff]  }
  0x71   :  { %1457 = vmatprep.subr.bf16.mxu1 %v2930_v57  ;;  %v3022_v57 = vld [vmem:[%s4223_s1 + $0x5cc] ss:$16 sps:$4 sm:$0xff]  }
  0x73   :  { %1380 = vmatpush2.bf16.msra.mxu0 %v2931_v60  ;;  %v3023_v60 = vld [vmem:[%s4223_s1 + $0x388] ss:$16 sps:$4 sm:$0xff]  }
  0x74   :  { %1458 = vmatpush2.bf16.msra.mxu1 %v2928_v59  ;;  %1381 = vmatprep.subr.bf16.mxu0 %v2939_v62  ;;  %v3020_v59 = vld [vmem:[%s4223_s1 + $0x5c8] ss:$16 sps:$4 sm:$0xff]   ;;  %v3031_v62 = vld [vmem:[%s4223_s1 + $0x36c] ss:$16 sps:$4 sm:$0xff]  }
  0x75   :  { %1459 = vmatprep.subr.bf16.mxu1 %v2936_v61  ;;  %v3028_v61 = vld [vmem:[%s4223_s1 + $0x5ac] ss:$16 sps:$4 sm:$0xff]  }
  0x77   :  { %1382 = vmatpush2.bf16.msra.mxu0 %v2937_v0  ;;  %v3029_v0 = vld [vmem:[%s4223_s1 + $0x368] ss:$16 sps:$4 sm:$0xff]  }
  0x78   :  { %1460 = vmatpush2.bf16.msra.mxu1 %v2934_v63  ;;  %1383 = vmatprep.subr.bf16.mxu0 %v2945_v2  ;;  %v3026_v63 = vld [vmem:[%s4223_s1 + $0x5a8] ss:$16 sps:$4 sm:$0xff]   ;;  %v3037_v2 = vld [vmem:[%s4223_s1 + $0x34c] ss:$16 sps:$4 sm:$0xff]  }
  0x79   :  { %1461 = vmatprep.subr.bf16.mxu1 %v2942_v1  ;;  %v3034_v1 = vld [vmem:[%s4223_s1 + $0x58c] ss:$16 sps:$4 sm:$0xff]  }
  0x7b   :  { %1384 = vmatpush2.bf16.msra.mxu0 %v2943_v4 }
  0x7c   :  { %1462 = vmatpush2.bf16.msra.mxu1 %v2940_v3  ;;  %1385 = vmatprep.subr.bf16.mxu0 %v2951_v8 }
  0x7d   :  { %1463 = vmatprep.subr.bf16.mxu1 %v2948_v5 }
  0x7f   :  { %1386 = vmatpush2.bf16.msra.mxu0 %v2949_v10 }
  0x80   :  { %1464 = vmatpush2.bf16.msra.mxu1 %v2946_v9  ;;  %1478 = vmatprep.subr.bf16.mxu0 %v2959_v12 }
  0x81   :  { %1465 = vmatprep.subr.bf16.mxu1 %v2956_v11 }
  0x82   :  { %1388 = vmatmul.mubr.bf16.vlgmr.msra.gmra.mxu0 %v3693_v14 }
  0x83   :  { %1479 = vmatpush1.bf16.msra.mxu0 %v2957_v16  ;;  %1510 = vmatprep.mubr.bf16.mxu0 %v3422_v51  ;;  %v2975_v51 = vld [vmem:[%s4223_s1 + $0x288] ss:$16 sps:$4 sm:$0xff]  }
  0x84   :  { %1466 = vmatpush2.bf16.msra.mxu1 %v2954_v15  ;;  %1480 = vmatprep.subr.bf16.mxu0 %v2965_v19 }
  0x85   :  { %1467 = vmatprep.subr.bf16.mxu1 %v2962_v18 }
  0x87   :  { %1481 = vmatpush1.bf16.msra.mxu0 %v2963_v21 }
  0x88   :  { %1468 = vmatpush2.bf16.msra.mxu1 %v2960_v20  ;;  %1482 = vmatprep.subr.bf16.mxu0 %v2971_v23 }
  0x89   :  { %1519 = vmatprep.subr.bf16.mxu1 %v2968_v22 }
  0x8b   :  { %1470 = vmatmul.mubr.bf16.vlgmr.msra.gmra.mxu1 %v3480_v6  ;;  %1483 = vmatpush1.bf16.msra.mxu0 %v2969_v25  ;;  %v2981_v6 = vld [vmem:[%s4223_s1 + $0x268] ss:$16 sps:$4 sm:$0xff]  }
  0x8c   :  { %1520 = vmatpush1.bf16.msra.mxu1 %v2966_v24  ;;  %1484 = vmatprep.subr.bf16.mxu0 %v2977_v27 }
  0x8d   :  { %1521 = vmatprep.subr.bf16.mxu1 %v2974_v26  ;;  %1551 = vmatprep.mubr.bf16.mxu1 %v3568_v33  ;;  %v2984_v33 = vld [vmem:[%s4223_s1 + $0x488] ss:$16 sps:$4 sm:$0xff]  }
  0x8f   :  { %1485 = vmatpush1.bf16.msra.mxu0 %v2975_v51 }
  0x90   :  { %1522 = vmatpush1.bf16.msra.mxu1 %v2972_v28  ;;  %1486 = vmatprep.subr.bf16.mxu0 %v2983_v30 }
  0x91   :  { %1523 = vmatprep.subr.bf16.mxu1 %v2980_v29 }
  0x93   :  { %1487 = vmatpush1.bf16.msra.mxu0 %v2981_v6 }
  0x94   :  { %1524 = vmatpush1.bf16.msra.mxu1 %v2978_v31  ;;  %1488 = vmatprep.subr.bf16.mxu0 %v2989_v34 }
  0x95   :  { %1525 = vmatprep.subr.bf16.mxu1 %v2986_v32 }
  0x97   :  { %1489 = vmatpush1.bf16.msra.mxu0 %v2987_v35 }
  0x98   :  { %1526 = vmatpush1.bf16.msra.mxu1 %v2984_v33  ;;  %1490 = vmatprep.subr.bf16.mxu0 %v2995_v37 }
  0x99   :  { %1527 = vmatprep.subr.bf16.mxu1 %v2992_v36 }
  0x9b   :  { %1491 = vmatpush1.bf16.msra.mxu0 %v2993_v39 }
  0x9c   :  { %1528 = vmatpush1.bf16.msra.mxu1 %v2990_v38  ;;  %1492 = vmatprep.subr.bf16.mxu0 %v3001_v41 }
  0x9d   :  { %1529 = vmatprep.subr.bf16.mxu1 %v2998_v40 }
  0x9f   :  { %1493 = vmatpush1.bf16.msra.mxu0 %v2999_v43 }
  0xa0   :  { %1530 = vmatpush1.bf16.msra.mxu1 %v2996_v42  ;;  %1494 = vmatprep.subr.bf16.mxu0 %v3007_v45 }
  0xa1   :  { %1531 = vmatprep.subr.bf16.mxu1 %v3004_v44 }
  0xa3   :  { %1495 = vmatpush2.bf16.msra.mxu0 %v3005_v47 }
  0xa4   :  { %1532 = vmatpush1.bf16.msra.mxu1 %v3002_v46  ;;  %1496 = vmatprep.subr.bf16.mxu0 %v3013_v49 }
  0xa5   :  { %1533 = vmatprep.subr.bf16.mxu1 %v3010_v48 }
  0xa7   :  { %1497 = vmatpush2.bf16.msra.mxu0 %v3011_v52 }
  0xa8   :  { %1534 = vmatpush1.bf16.msra.mxu1 %v3008_v50  ;;  %1498 = vmatprep.subr.bf16.mxu0 %v3019_v54 }
  0xa9   :  { %1535 = vmatprep.subr.bf16.mxu1 %v3016_v53 }
  0xab   :  { %1499 = vmatpush2.bf16.msra.mxu0 %v3017_v56 }
  0xac   :  { %1536 = vmatpush2.bf16.msra.mxu1 %v3014_v55  ;;  %1500 = vmatprep.subr.bf16.mxu0 %v3025_v58 }
  0xad   :  { %1537 = vmatprep.subr.bf16.mxu1 %v3022_v57 }
  0xaf   :  { %1501 = vmatpush2.bf16.msra.mxu0 %v3023_v60 }
  0xb0   :  { %1538 = vmatpush2.bf16.msra.mxu1 %v3020_v59  ;;  %1502 = vmatprep.subr.bf16.mxu0 %v3031_v62 }
  0xb1   :  { %1539 = vmatprep.subr.bf16.mxu1 %v3028_v61 }
  0xb2   :  { %17 = vsyncpa [#allocation3], 0  ;;  %v3032_v3 = vld [vmem:[%s4223_s1 + $0x588] ss:$16 sps:$4 sm:$0xff]   ;;  %v3040_v5 = vld [vmem:[%s4223_s1 + $0x56c] ss:$16 sps:$4 sm:$0xff]  }
  0xb3   :  { %1503 = vmatpush2.bf16.msra.mxu0 %v3029_v0  ;;  %v3035_v4 = vld [vmem:[%s4223_s1 + $0x348] ss:$16 sps:$4 sm:$0xff]   ;;  %v3043_v8 = vld [vmem:[%s4223_s1 + $0x32c] ss:$16 sps:$4 sm:$0xff]   ;;  %vm3203_vm1 = vmmov 0   ;;  %s3204_s18 = smov [#allocation2]  }
  0xb4   :  { %1540 = vmatpush2.bf16.msra.mxu1 %v3026_v63  ;;  %1504 = vmatprep.subr.bf16.mxu0 %v3037_v2  ;;  %v3038_v9 = vld [vmem:[%s4223_s1 + $0x568] ss:$16 sps:$4 sm:$0xff]   ;;  %v3046_v11 = vld [vmem:[%s4223_s1 + $0x54c] ss:$16 sps:$4 sm:$0xff]  }
  0xb5   :  { %1541 = vmatprep.subr.bf16.mxu1 %v3034_v1  ;;  %v3041_v10 = vld [vmem:[%s4223_s1 + $0x328] ss:$16 sps:$4 sm:$0xff]   ;;  %v3049_v12 = vld [vmem:[%s4223_s1 + $0x30c] ss:$16 sps:$4 sm:$0xff]  }
  0xb6   :  { %v3044_v15 = vld [vmem:[%s4223_s1 + $0x548] ss:$16 sps:$4 sm:$0xff]   ;;  %v3052_v18 = vld [vmem:[%s4223_s1 + $0x52c] ss:$16 sps:$4 sm:$0xff]  }
  0xb7   :  { %1505 = vmatpush2.bf16.msra.mxu0 %v3035_v4  ;;  %v3047_v16 = vld [vmem:[%s4223_s1 + $0x308] ss:$16 sps:$4 sm:$0xff]   ;;  %v3055_v19 = vld [vmem:[%s4223_s1 + $0x60c] ss:$16 sps:$4 sm:$0xff]  }
  0xb8   :  { %1542 = vmatpush2.bf16.msra.mxu1 %v3032_v3  ;;  %1506 = vmatprep.subr.bf16.mxu0 %v3043_v8  ;;  %v3050_v20 = vld [vmem:[%s4223_s1 + $0x528] ss:$16 sps:$4 sm:$0xff]   ;;  %v3058_v22 = vld [vmem:[%s4223_s1 + $0x50c] ss:$16 sps:$4 sm:$0xff]  }
  0xb9   :  { %1543 = vmatprep.subr.bf16.mxu1 %v3040_v5  ;;  %v3053_v21 = vld [vmem:[%s4223_s1 + $0x608] ss:$16 sps:$4 sm:$0xff]   ;;  %v3061_v23 = vld [vmem:[%s4226_s4 + $0x74] ss:$8 sps:$4 sm:$0xff]   ;;  %v3064_v26 = vld [vmem:[%s4226_s4 + $0x64] ss:$8 sps:$4 sm:$0xff]  }
  0xba   :  { %v3056_v24 = vld [vmem:[%s4223_s1 + $0x508] ss:$16 sps:$4 sm:$0xff]   ;;  %v3109_v28 = vld [vmem:[%s4226_s4 + $0x174] ss:$8 sps:$4 sm:$0xff]   ;;  %v3112_v51 = vld [vmem:[%s4226_s4 + $0x164] ss:$8 sps:$4 sm:$0xff]  }
  0xbb   :  { %1507 = vmatpush2.bf16.msra.mxu0 %v3041_v10  ;;  %v3059_v25 = vld [vmem:[%s4226_s4 + $0x70] ss:$8 sps:$4 sm:$0xff]   ;;  %v3068_v29 = vld [vmem:[%s4226_s4 + $0x40] ss:$8 sps:$4 sm:$0xff]   ;;  %v3073_v31 = vld [vmem:[%s4226_s4 + $0x34] ss:$8 sps:$4 sm:$0xff]  }
  0xbc   :  { %1544 = vmatpush2.bf16.msra.mxu1 %v3038_v9  ;;  %1508 = vmatprep.subr.bf16.mxu0 %v3049_v12  ;;  %v3065_v27 = vld [vmem:[%s4226_s4 + $0x50] ss:$8 sps:$4 sm:$0xff]   ;;  %v3110_v30 = vld [vmem:[%s4226_s4 + $0x160] ss:$8 sps:$4 sm:$0xff]   ;;  %v3115_v6 = vld [vmem:[%s4226_s4 + $0x154] ss:$8 sps:$4 sm:$0xff]  }
  0xbd   :  { %1545 = vmatprep.subr.bf16.mxu1 %v3046_v11  ;;  %v3071_v32 = vld [vmem:[%s4226_s4 + $0x30] ss:$8 sps:$4 sm:$0xff]   ;;  %v3076_v33 = vld [vmem:[%s4226_s4 + $0x24] ss:$8 sps:$4 sm:$0xff]   ;;  %v3074_v36 = vld [vmem:[%s4226_s4 + $0x20] ss:$8 sps:$4 sm:$0xff]  }
  0xbe   :  { %v3113_v34 = vld [vmem:[%s4226_s4 + $0x150] ss:$8 sps:$4 sm:$0xff]   ;;  %v3118_v35 = vld [vmem:[%s4226_s4 + $0x144] ss:$8 sps:$4 sm:$0xff]   ;;  %v3116_v37 = vld [vmem:[%s4226_s4 + $0x140] ss:$8 sps:$4 sm:$0xff]  }
  0xbf   :  { %1509 = vmatpush2.bf16.msra.mxu0 %v3047_v16  ;;  %v3079_v38 = vld [vmem:[%s4226_s4 + $0x14] ss:$8 sps:$4 sm:$0xff]   ;;  %v3077_v40 = vld [vmem:[%s4226_s4 + $0x10] ss:$8 sps:$4 sm:$0xff]   ;;  %v3082_v42 = vld [vmem:[%s4226_s4 + $0x4] ss:$8 sps:$4 sm:$0xff]  }
  0xc0   :  { %1546 = vmatpush2.bf16.msra.mxu1 %v3044_v15  ;;  %1574 = vmatprep.subr.bf16.mxu0 %v3055_v19  ;;  %v3121_v39 = vld [vmem:[%s4226_s4 + $0x134] ss:$8 sps:$4 sm:$0xff]   ;;  %v3119_v41 = vld [vmem:[%s4226_s4 + $0x130] ss:$8 sps:$4 sm:$0xff]   ;;  %v3124_v43 = vld [vmem:[%s4226_s4 + $0x124] ss:$8 sps:$4 sm:$0xff]  }
  0xc1   :  { %1547 = vmatprep.subr.bf16.mxu1 %v3052_v18  ;;  %v3080_v44 = vld [vmem:[%s4226_s4] ss:$8 sps:$4 sm:$0xff]   ;;  %v3085_v46 = vld [vmem:[%s4226_s4 + $0xf4] ss:$8 sps:$4 sm:$0xff]   ;;  %v3083_v48 = vld [vmem:[%s4226_s4 + $0xf0] ss:$8 sps:$4 sm:$0xff]  }
  0xc2   :  { %1511 = vmatmul.mubr.bf16.vlgmr.msra.gmra.mxu0 %v3482_v7  ;;  %v3062_v7 = vld [vmem:[%s4226_s4 + $0x60] ss:$8 sps:$4 sm:$0xff]   ;;  %v3127_v47 = vld [vmem:[%s4226_s4 + $0x114] ss:$8 sps:$4 sm:$0xff]   ;;  %v3125_v49 = vld [vmem:[%s4226_s4 + $0x110] ss:$8 sps:$4 sm:$0xff]  }
  0xc3   :  { %1575 = vmatpush1.bf16.msra.mxu0 %v3053_v21  ;;  %1592 = vmatprep.mubr.bf16.mxu0 %v3201_v13  ;;  %v3067_v13 = vld [vmem:[%s4226_s4 + $0x54] ss:$8 sps:$4 sm:$0xff]   ;;  %v3122_v45 = vld [vmem:[%s4226_s4 + $0x120] ss:$8 sps:$4 sm:$0xff]   ;;  %v3088_v50 = vld [vmem:[%s4226_s4 + $0xe4] ss:$8 sps:$4 sm:$0xff]  }
  0xc4   :  { %1548 = vmatpush2.bf16.msra.mxu1 %v3050_v20  ;;  %2013 = vmatprep.subr.bf16.mxu0 %v3061_v23  ;;  %v3130_v52 = vld [vmem:[%s4226_s4 + $0x104] ss:$8 sps:$4 sm:$0xff]   ;;  %v3086_v53 = vld [vmem:[%s4226_s4 + $0xe0] ss:$8 sps:$4 sm:$0xff]   ;;  %v3091_v55 = vld [vmem:[%s4226_s4 + $0xd4] ss:$8 sps:$4 sm:$0xff]  }
  0xc5   :  { %1549 = vmatprep.subr.bf16.mxu1 %v3058_v22  ;;  %v3128_v54 = vld [vmem:[%s4226_s4 + $0x100] ss:$8 sps:$4 sm:$0xff]   ;;  %v3133_v56 = vld [vmem:[%s4226_s4 + $0x1f4] ss:$8 sps:$4 sm:$0xff]   ;;  %v3089_v57 = vld [vmem:[%s4226_s4 + $0xd0] ss:$8 sps:$4 sm:$0xff]  }
  0xc6   :  { %v3131_v58 = vld [vmem:[%s4226_s4 + $0x1f0] ss:$8 sps:$4 sm:$0xff]   ;;  %v3094_v59 = vld [vmem:[%s4226_s4 + $0xc4] ss:$8 sps:$4 sm:$0xff]   ;;  %v3092_v61 = vld [vmem:[%s4226_s4 + $0xc0] ss:$8 sps:$4 sm:$0xff]  }
  0xc7   :  { %v3136_v60 = vld [vmem:[%s4226_s4 + $0x1e4] ss:$8 sps:$4 sm:$0xff]   ;;  %v3134_v62 = vld [vmem:[%s4226_s4 + $0x1e0] ss:$8 sps:$4 sm:$0xff]   ;;  %v3097_v63 = vld [vmem:[%s4226_s4 + $0xb4] ss:$8 sps:$4 sm:$0xff]  }
  0xc8   :  { %1550 = vmatpush2.bf16.msra.mxu1 %v3056_v24  ;;  %v3139_v0 = vld [vmem:[%s4226_s4 + $0x1d4] ss:$8 sps:$4 sm:$0xff]   ;;  %v3095_v1 = vld [vmem:[%s4226_s4 + $0xb0] ss:$8 sps:$4 sm:$0xff]   ;;  %v3100_v3 = vld [vmem:[%s4226_s4 + $0xa4] ss:$8 sps:$4 sm:$0xff]  }
  0xc9   :  { %2054 = vmatprep.subr.bf16.mxu1 %v3109_v28  ;;  %v3137_v2 = vld [vmem:[%s4226_s4 + $0x1d0] ss:$8 sps:$4 sm:$0xff]   ;;  %v3098_v4 = vld [vmem:[%s4226_s4 + $0xa0] ss:$8 sps:$4 sm:$0xff]   ;;  %v3103_v5 = vld [vmem:[%s4226_s4 + $0x94] ss:$8 sps:$4 sm:$0xff]  }
  0xca   :  { %2612 = vmatmul.mubr.msk.bf16.vlgmr.msra.gmra.mxu0 %vm1269_vm0, %v3514_v17  ;;  %v3070_v17 = vld [vmem:[%s4226_s4 + $0x44] ss:$8 sps:$4 sm:$0xff]   ;;  %v3101_v8 = vld [vmem:[%s4226_s4 + $0x90] ss:$8 sps:$4 sm:$0xff]   ;;  %v3104_v15 = vld [vmem:[%s4226_s4 + $0x80] ss:$8 sps:$4 sm:$0xff]  }
  0xcb   :  { %1552 = vmatmul.mubr.bf16.vlgmr.msra.gmra.mxu1 %v3693_v14  ;;  %2014 = vmatpush1.bf16.msra.mxu0 %v3059_v25  ;;  %v3107_v14 = vld [vmem:[%s4226_s4 + $0x170] ss:$8 sps:$4 sm:$0xff]   ;;  %v3106_v9 = vld [vmem:[%s4226_s4 + $0x84] ss:$8 sps:$4 sm:$0xff]   ;;  %v3140_v16 = vld [vmem:[%s4226_s4 + $0x1c0] ss:$8 sps:$4 sm:$0xff]  }
  0xcc   :  { %2015 = vmatprep.subr.bf16.mxu0 %v3064_v26  ;;  %2055 = vmatpush1.bf16.msra.mxu1 %v3107_v14  ;;  %v3142_v12 = vld [vmem:[%s4226_s4 + $0x1c4] ss:$8 sps:$4 sm:$0xff]   ;;  %v3143_v22 = vld [vmem:[%s4226_s4 + $0x1b0] ss:$8 sps:$4 sm:$0xff]   ;;  %v3145_v23 = vld [vmem:[%s4226_s4 + $0x1b4] ss:$8 sps:$4 sm:$0xff]  }
  0xcd   :  { %2056 = vmatprep.subr.bf16.mxu1 %v3112_v51  ;;  %v3151_v14 = vld [vmem:[%s4226_s4 + $0x194] ss:$8 sps:$4 sm:$0xff]   ;;  %v3149_v28 = vld [vmem:[%s4226_s4 + $0x190] ss:$8 sps:$4 sm:$0xff]   ;;  %s2400_s1 = sshll.u32 %s3204_s18, 4  ;;  %s2401_s1 = int_to_ptr.vmem [resolvable:$true] %s2400_s1 }
  0xce   :  { %p3184_p1 = scmp.lt.s32.totalorder %s2401_s1, %s2401_s1 }
  0xcf   :  { %2016 = vmatpush1.bf16.msra.mxu0 %v3062_v7  ;;  %v3148_v7 = vld [vmem:[%s4226_s4 + $0x1a4] ss:$8 sps:$4 sm:$0xff]  }
  0xd0   :  { %2017 = vmatprep.subr.bf16.mxu0 %v3067_v13  ;;  %2057 = vmatpush1.bf16.msra.mxu1 %v3110_v30  ;;  %v3146_v13 = vld [vmem:[%s4226_s4 + $0x1a0] ss:$8 sps:$4 sm:$0xff]  }
  0xd1   :  { %2058 = vmatprep.subr.bf16.mxu1 %v3115_v6  ;;  %v3152_v30 = vld [vmem:[%s4226_s4 + $0x180] ss:$8 sps:$4 sm:$0xff]  }
  0xd3   :  { %2018 = vmatpush1.bf16.msra.mxu0 %v3065_v27 }
  0xd4   :  { %2019 = vmatprep.subr.bf16.mxu0 %v3070_v17  ;;  %2059 = vmatpush1.bf16.msra.mxu1 %v3113_v34  ;;  %v243_v34 = vld [vmem:[%s4224_s2] sm:$0xf] }
  0xd5   :  { %2060 = vmatprep.subr.bf16.mxu1 %v3118_v35 }
  0xd7   :  { %2020 = vmatpush1.bf16.msra.mxu0 %v3068_v29  ;;  %v3154_v29 = vld [vmem:[%s4226_s4 + $0x184] ss:$8 sps:$4 sm:$0xff]  }
  0xd8   :  { %2021 = vmatprep.subr.bf16.mxu0 %v3073_v31  ;;  %2061 = vmatpush1.bf16.msra.mxu1 %v3116_v37  ;;  %v245_v31 = vlaneseq }
  0xd9   :  { %2062 = vmatprep.subr.bf16.mxu1 %v3121_v39 }
  0xda   :  { %v4100_v6 = vshrl.u32 %v245_v31, 7  ;;  %v3156_v31 = vld [vmem:[%s4229_s7 + $0x38] sm:$0xff]  }
  0xdb   :  { %2022 = vmatpush1.bf16.msra.mxu0 %v3071_v32 }
  0xdc   :  { %2023 = vmatprep.subr.bf16.mxu0 %v3076_v33  ;;  %2063 = vmatpush1.bf16.msra.mxu1 %v3119_v41  ;;  %v247_v32 = vsub.s32 0, %v4100_v6  ;;  %v251_v33 = vsub.s32 1, %v4100_v6 }
  0xdd   :  { %2064 = vmatprep.subr.bf16.mxu1 %v3124_v43 }
  0xde   :  { %v248_v35 = vrot.slane %v243_v34, %v247_v32 }
  0xdf   :  { %2024 = vmatpush1.bf16.msra.mxu0 %v3074_v36  ;;  %v252_v36 = vrot.slane %v243_v34, %v251_v33 }
  0xe0   :  { %2025 = vmatprep.subr.bf16.mxu0 %v3079_v38  ;;  %2065 = vmatpush1.bf16.msra.mxu1 %v3122_v45 }
  0xe1   :  { %2066 = vmatprep.subr.bf16.mxu1 %v3127_v47 }
  0xe3   :  { %2026 = vmatpush1.bf16.msra.mxu0 %v3077_v40 }
  0xe4   :  { %2027 = vmatprep.subr.bf16.mxu0 %v3082_v42  ;;  %2067 = vmatpush1.bf16.msra.mxu1 %v3125_v49 }
  0xe5   :  { %2068 = vmatprep.subr.bf16.mxu1 %v3130_v52  ;;  %v1606_v52 = vld [vmem:[%s4225_s3 + $0x8] sm:$0xff] }
  0xe7   :  { %2028 = vmatpush1.bf16.msra.mxu0 %v3080_v44 }
  0xe8   :  { %2029 = vmatprep.subr.bf16.mxu0 %v3085_v46  ;;  %2069 = vmatpush1.bf16.msra.mxu1 %v3128_v54 }
  0xe9   :  { %2070 = vmatprep.subr.bf16.mxu1 %v3133_v56 }
  0xeb   :  { %2030 = vmatpush2.bf16.msra.mxu0 %v3083_v48  ;;  %v1605_v48 = vld [vmem:[%s4225_s3] sm:$0xff] }
  0xec   :  { %2031 = vmatprep.subr.bf16.mxu0 %v3088_v50  ;;  %2071 = vmatpush2.bf16.msra.mxu1 %v3131_v58 }
  0xed   :  { %2072 = vmatprep.subr.bf16.mxu1 %v3136_v60 }
  0xef   :  { %2032 = vmatpush2.bf16.msra.mxu0 %v3086_v53 }
  0xf0   :  { %2033 = vmatprep.subr.bf16.mxu0 %v3091_v55  ;;  %2073 = vmatpush2.bf16.msra.mxu1 %v3134_v62  ;;  %v255_v62 = vsub.s32 2, %v4100_v6 }
  0xf1   :  { %2074 = vmatprep.subr.bf16.mxu1 %v3139_v0 }
  0xf3   :  { %2034 = vmatpush2.bf16.msra.mxu0 %v3089_v57 }
  0xf4   :  { %2035 = vmatprep.subr.bf16.mxu0 %v3094_v59  ;;  %2075 = vmatpush2.bf16.msra.mxu1 %v3137_v2 }
  0xf5   :  { %2076 = vmatprep.subr.bf16.mxu1 %v3142_v12 }
  0xf7   :  { %2036 = vmatpush2.bf16.msra.mxu0 %v3092_v61 }
  0xf8   :  { %2037 = vmatprep.subr.bf16.mxu0 %v3097_v63  ;;  %2077 = vmatpush2.bf16.msra.mxu1 %v3140_v16  ;;  %v259_v63 = vsub.s32 3, %v4100_v6 }
  0xf9   :  { %2078 = vmatprep.subr.bf16.mxu1 %v3145_v23 }
  0xfb   :  { %2038 = vmatpush2.bf16.msra.mxu0 %v3095_v1  ;;  %v256_v1 = vrot.slane %v243_v34, %v255_v62 }
  0xfc   :  { %2039 = vmatprep.subr.bf16.mxu0 %v3100_v3  ;;  %2079 = vmatpush2.bf16.msra.mxu1 %v3143_v22  ;;  %v260_v3 = vrot.slane %v243_v34, %v259_v63  ;;  %v3157_v34 = vld [vmem:[%s4229_s7 + $0x70] sm:$0xff]  }
  0xfd   :  { %2080 = vmatprep.subr.bf16.mxu1 %v3148_v7  ;;  %v1608_v7 = vld [vmem:[%s4225_s3 + $0x18] sm:$0xff] }
  0xff   :  { %2040 = vmatpush2.bf16.msra.mxu0 %v3098_v4 }
 0x100   :  { %2041 = vmatprep.subr.bf16.mxu0 %v3103_v5  ;;  %2081 = vmatpush2.bf16.msra.mxu1 %v3146_v13 }
 0x101   :  { %2082 = vmatprep.subr.bf16.mxu1 %v3151_v14 }
 0x102   :  { %v1307_v10 = vpop.f32.mrf.mxu0 }
 0x103   :  { %v1348_v11 = vpop.f32.mrf.mxu1  ;;  %2042 = vmatpush2.bf16.msra.mxu0 %v3101_v8  ;;  %v1308_v37 = vadd.f32 %v1307_v10, %v248_v35  ;;  %v3158_v35 = vld [vmem:[%s4229_s7 + $0x30] sm:$0xff]  }
 0x104   :  { %v1309_v18 = vpop.f32.mrf.mxu0  ;;  %2043 = vmatprep.subr.bf16.mxu0 %v3106_v9  ;;  %2083 = vmatpush2.bf16.msra.mxu1 %v3149_v28 }
 0x105   :  { %v1350_v19 = vpop.f32.mrf.mxu1  ;;  %2084 = vmatprep.subr.bf16.mxu1 %v3154_v29  ;;  %v1310_v38 = vadd.f32 %v1309_v18, %v252_v36  ;;  %v1349_v39 = vadd.f32 %v1348_v11, %v1308_v37  ;;  %v3159_v36 = vld [vmem:[%s4229_s7 + $0x68] sm:$0xff]  }
 0x106   :  { %v1311_v20 = vpop.f32.mrf.mxu0  ;;  %v3160_v37 = vld [vmem:[%s4229_s7 + $0x28] sm:$0xff]  }
 0x107   :  { %v1352_v21 = vpop.f32.mrf.mxu1  ;;  %2044 = vmatpush2.bf16.msra.mxu0 %v3104_v15  ;;  %v1351_v41 = vadd.f32 %v1350_v19, %v1310_v38  ;;  %v3161_v38 = vld [vmem:[%s4229_s7 + $0x60] sm:$0xff]  }
 0x108   :  { %v1312_v24 = vpop.f32.mrf.mxu0  ;;  %2085 = vmatpush2.bf16.msra.mxu1 %v3152_v30  ;;  %v3155_v30 = vld [vmem:[%s4229_s7 + $0x78] sm:$0xff]  }
 0x109   :  { %v1353_v25 = vpop.f32.mrf.mxu1  ;;  %2703 = vmatprep.subr.bf16.mxu0 %v3155_v30 }
 0x10a   :  { %v1607_v25 = vld [vmem:[%s4225_s3 + $0x10] sm:$0xff] }
 0x10b   :  { %v1430_v26 = vpop.f32.mrf.mxu1 }
 0x10d   :  { %v1432_v27 = vpop.f32.mrf.mxu1 }
 0x10f   :  { %v1434_v17 = vpop.f32.mrf.mxu1 }
 0x111   :  { %v1435_v51 = vpop.f32.mrf.mxu1 }
 0x142   :  { %v1389_v40 = vpop.f32.mrf.mxu0 }
 0x143   :  { %v1390_v42 = vadd.f32 %v1389_v40, %v1349_v39  ;;  %v3162_v39 = vld [vmem:[%s4229_s7 + $0x20] sm:$0xff]   ;;  %v3163_v40 = vld [vmem:[%s4229_s7 + $0x58] sm:$0xff]  }
 0x144   :  { %v1391_v43 = vpop.f32.mrf.mxu0 }
 0x145   :  { %v1431_v44 = vadd.f32 %v1430_v26, %v1390_v42  ;;  %v1392_v45 = vadd.f32 %v1391_v43, %v1351_v41  ;;  %v3164_v41 = vld [vmem:[%s4229_s7 + $0x18] sm:$0xff]   ;;  %v3165_v42 = vld [vmem:[%s4229_s7 + $0x50] sm:$0xff]  }
 0x146   :  { %v1393_v46 = vpop.f32.mrf.mxu0  ;;  %v3166_v43 = vld [vmem:[%s4229_s7 + $0x10] sm:$0xff]  }
 0x147   :  { %v1601_v47 = vmax.f32 %v1431_v44, 0.0  ;;  %v1433_v49 = vadd.f32 %v1432_v27, %v1392_v45  ;;  %v3167_v44 = vld [vmem:[%s4229_s7 + $0x48] sm:$0xff]   ;;  %v3169_v46 = vld [vmem:[%s4229_s7 + $0x40] sm:$0xff]  }
 0x148   :  { %v1394_v50 = vpop.f32.mrf.mxu0  ;;  %v3168_v45 = vld [vmem:[%s4229_s7 + $0x8] sm:$0xff]  }
 0x149   :  { %v1602_v53 = vmax.f32 %v1433_v49, 0.0  ;;  %v1609_v54 = vmul.f32 %v1605_v48, %v1601_v47  ;;  %v3170_v47 = vld [vmem:[%s4229_s7] sm:$0xff]   ;;  %v3171_v48 = vld [vmem:[%s4232_s10 + $0x38] sm:$0xff]   ;;  %v3202_v49 = vmov 0.0   ;;  %v3172_v50 = vld [vmem:[%s4232_s10 + $0x30] sm:$0xff]  }
 0x14a   :  { %2734 = vmatprep.subr.bf16.mxu1 %v3202_v49 }
 0x14b   :  { %v1471_v55 = vpop.f32.mrf.mxu1  ;;  %v1610_v56 = vmul.f32 %v1606_v52, %v1602_v53  ;;  %v1613_v59 = vpack.c.bf16 %v1609_v54, %v1609_v54  ;;  %v3173_v52 = vld [vmem:[%s4232_s10 + $0x28] sm:$0xff]   ;;  %v3174_v53 = vld [vmem:[%s4232_s10 + $0x20] sm:$0xff]   ;;  %v3175_v54 = vld [vmem:[%s4232_s10 + $0x18] sm:$0xff]  }
 0x14c   :  { %v1472_v5 = vadd.f32 %v1471_v55, %v256_v1 }
 0x14d   :  { %v1473_v57 = vpop.f32.mrf.mxu1  ;;  %v1614_v58 = vpack.c.bf16 %v1610_v56, %v1610_v56 }
 0x14e   :  { %v1474_v9 = vadd.f32 %v1473_v57, %v260_v3 }
 0x14f   :  { %v1475_v60 = vpop.f32.mrf.mxu1  ;;  %2045 = vmatprep.mubr.bf16.mxu0 %v1614_v58 }
 0x150   :  { %2046 = vmatmul.mubr.bf16.vlgmr.msra.gmra.mxu0 %v1613_v59  ;;  %v1681_v59 = vld [vmem:[%s4227_s5] sm:$0x3] }
 0x151   :  { %v1476_v61 = vpop.f32.mrf.mxu1  ;;  %2704 = vmatpush3.bf16.msra.mxu0 %v3156_v31  ;;  %v1686_v60 = vrot.slane %v1681_v59, %v247_v32 }
 0x152   :  { %2705 = vmatprep.subr.bf16.mxu0 %v3157_v34  ;;  %v1690_v61 = vrot.slane %v1681_v59, %v251_v33 }
 0x155   :  { %2706 = vmatpush3.bf16.msra.mxu0 %v3158_v35 }
 0x156   :  { %2707 = vmatprep.subr.bf16.mxu0 %v3159_v36 }
 0x159   :  { %2708 = vmatpush3.bf16.msra.mxu0 %v3160_v37 }
 0x15a   :  { %2709 = vmatprep.subr.bf16.mxu0 %v3161_v38 }
 0x15d   :  { %2710 = vmatpush3.bf16.msra.mxu0 %v3162_v39 }
 0x15e   :  { %2711 = vmatprep.subr.bf16.mxu0 %v3163_v40 }
 0x161   :  { %2712 = vmatpush3.bf16.msra.mxu0 %v3164_v41 }
 0x162   :  { %2713 = vmatprep.subr.bf16.mxu0 %v3165_v42 }
 0x165   :  { %2714 = vmatpush3.bf16.msra.mxu0 %v3166_v43 }
 0x166   :  { %2715 = vmatprep.subr.bf16.mxu0 %v3167_v44 }
 0x169   :  { %2716 = vmatpush3.bf16.msra.mxu0 %v3168_v45 }
 0x16a   :  { %2717 = vmatprep.subr.bf16.mxu0 %v3169_v46 }
 0x16d   :  { %2718 = vmatpush3.bf16.msra.mxu0 %v3170_v47 }
 0x182   :  { %v1512_v0 = vpop.f32.mrf.mxu0 }
 0x183   :  { %v1513_v10 = vadd.f32 %v1512_v0, %v1472_v5 }
 0x184   :  { %v1514_v2 = vpop.f32.mrf.mxu0 }
 0x185   :  { %v1515_v15 = vadd.f32 %v1514_v2, %v1474_v9 }
 0x186   :  { %v1516_v4 = vpop.f32.mrf.mxu0 }
 0x187   :  { %v2097_v4 = vld [vmem:[%s4228_s6] sm:$0xff] }
 0x188   :  { %v1517_v8 = vpop.f32.mrf.mxu0 }
 0x189   :  { %v2098_v8 = vld [vmem:[%s4228_s6 + $0x8] sm:$0xff] }
 0x18a   :  { %v1594_v12 = vpop.f32.mrf.mxu0 }
 0x18b   :  { %v1553_v11 = vpop.f32.mrf.mxu1 }
 0x18c   :  { %v1554_v16 = vadd.f32 %v1553_v11, %v1513_v10  ;;  %v1596_v19 = vpop.f32.mrf.mxu0 }
 0x18d   :  { %v1555_v18 = vpop.f32.mrf.mxu1 }
 0x18e   :  { %v1595_v20 = vadd.f32 %v1594_v12, %v1554_v16  ;;  %v1556_v21 = vadd.f32 %v1555_v18, %v1515_v15  ;;  %v1598_v23 = vpop.f32.mrf.mxu0  ;;  %v3176_v15 = vld [vmem:[%s4232_s10 + $0x10] sm:$0xff]   ;;  %v3177_v16 = vld [vmem:[%s4232_s10 + $0x8] sm:$0xff]   ;;  %v3178_v18 = vld [vmem:[%s4232_s10] sm:$0xff]  }
 0x18f   :  { %v1557_v22 = vpop.f32.mrf.mxu1 }
 0x190   :  { %v1603_v24 = vmax.f32 %v1595_v20, 0.0  ;;  %v1597_v26 = vadd.f32 %v1596_v19, %v1556_v21  ;;  %v1599_v27 = vpop.f32.mrf.mxu0  ;;  %v2677_v20 = vld [vmem:[%s4230_s8] ss:$0 sm:$0xff]  ;;  %s3179_s8 = scalar_lea.vmem %s2401_s1, 128 }
 0x191   :  { %v1558_v13 = vpop.f32.mrf.mxu1  ;;  %p3180_p0 = scmp.ne.s32.totalorder %s2401_s1, %s3179_s8  ;;  %p3185_p2 = scmp.lt.s32.totalorder %s3179_s8, %s3179_s8 }
 0x192   :  { %v1604_v17 = vmax.f32 %v1597_v26, 0.0  ;;  %v1611_v14 = vmul.f32 %v1607_v25, %v1603_v24  ;;  %v2279_v25 = vld [vmem:[%s4231_s9] sm:$0xff] }
 0x193   :  { %p3186_p3 = por %p3185_p2, %p3184_p1 }
 0x194   :  { %v1612_v28 = vmul.f32 %v1608_v7, %v1604_v17  ;;  %v1615_v29 = vpack.c.bf16 %v1611_v14, %v1611_v14  ;;  %v2694_v17 = vld [vmem:[%s4233_s11] ss:$0 sm:$0xff] }
 0x195   :  { %p3187_p4 = pnand %p3186_p3, %p3180_p0 }
 0x196   :  { %v1616_v51 = vpack.c.bf16 %v1612_v28, %v1612_v28 }
 0x198   :  { %2086 = vmatprep.mubr.bf16.mxu1 %v1616_v51 }
 0x199   :  { %2087 = vmatmul.mubr.bf16.vlgmr.msra.gmra.mxu1 %v1615_v29 }
 0x19a   :  { %2735 = vmatpush3.bf16.msra.mxu1 %v3171_v48  ;;  %2750 = vmatprep.mubr.msk.bf16.mxu1 %vm3203_vm1, %v3202_v49 }
 0x19b   :  { %2736 = vmatprep.subr.bf16.mxu1 %v3202_v49 }
 0x19e   :  { %2737 = vmatpush3.bf16.msra.mxu1 %v3172_v50 }
 0x19f   :  { %2738 = vmatprep.subr.bf16.mxu1 %v3202_v49 }
 0x1a2   :  { %2739 = vmatpush3.bf16.msra.mxu1 %v3173_v52 }
 0x1a3   :  { %2740 = vmatprep.subr.bf16.mxu1 %v3202_v49 }
 0x1a6   :  { %2741 = vmatpush3.bf16.msra.mxu1 %v3174_v53 }
 0x1a7   :  { %2742 = vmatprep.subr.bf16.mxu1 %v3202_v49 }
 0x1aa   :  { %2743 = vmatpush3.bf16.msra.mxu1 %v3175_v54 }
 0x1ab   :  { %2744 = vmatprep.subr.bf16.mxu1 %v3202_v49 }
 0x1ae   :  { %2745 = vmatpush3.bf16.msra.mxu1 %v3176_v15 }
 0x1af   :  { %2746 = vmatprep.subr.bf16.mxu1 %v3202_v49 }
 0x1b2   :  { %2747 = vmatpush3.bf16.msra.mxu1 %v3177_v16 }
 0x1b3   :  { %2748 = vmatprep.subr.bf16.mxu1 %v3202_v49 }
 0x1b6   :  { %2749 = vmatpush3.bf16.msra.mxu1 %v3178_v18 }
 0x210   :  { %v2047_v55 = vpop.f32.mrf.mxu0 }
 0x211   :  { %v2048_v62 = vadd.f32 %v2047_v55, %v1686_v60 }
 0x212   :  { %v2049_v56 = vpop.f32.mrf.mxu0 }
 0x213   :  { %v2050_v0 = vadd.f32 %v2049_v56, %v1690_v61 }
 0x214   :  { %v2051_v57 = vpop.f32.mrf.mxu0 }
 0x216   :  { %v2052_v58 = vpop.f32.mrf.mxu0 }
 0x259   :  { %v2088_v63 = vpop.f32.mrf.mxu1 }
 0x25a   :  { %v2089_v1 = vadd.f32 %v2088_v63, %v2048_v62 }
 0x25b   :  { %v2090_v2 = vpop.f32.mrf.mxu1 }
 0x25c   :  { %v2095_v3 = vmax.f32 %v2089_v1, 0.0  ;;  %v2091_v5 = vadd.f32 %v2090_v2, %v2050_v0 }
 0x25d   :  { %v2092_v9 = vpop.f32.mrf.mxu1 }
 0x25e   :  { %v2096_v32 = vmax.f32 %v2091_v5, 0.0  ;;  %v2099_v10 = vmul.f32 %v2097_v4, %v2095_v3 }
 0x25f   :  { %v2093_v6 = vpop.f32.mrf.mxu1 }
 0x260   :  { %v2100_v33 = vmul.f32 %v2098_v8, %v2096_v32  ;;  %v2101_v12 = vpack.c.bf16 %v2099_v10, %v2099_v10 }
 0x262   :  { %v2102_v11 = vpack.c.bf16 %v2100_v33, %v2100_v33 }
 0x264   :  { %2270 = vmatprep.mubr.bf16.mxu0 %v2102_v11 }
 0x265   :  { %2271 = vmatmul.mubr.bf16.vlgmr.msra.gmra.mxu0 %v2101_v12 }
 0x325   :  { %v2719_v19 = vpop.f32.mrf.mxu0 }
 0x327   :  { %v2720_v21 = vpop.f32.mrf.mxu0 }
 0x328   :  { %v2721_v22 = vadd.f32 %v2720_v21, %v2719_v19 }
 0x329   :  { %v2722_v23 = vpop.f32.mrf.mxu0 }
 0x32a   :  { %v2273_v24 = vadd.f32 %v2721_v22, %v2677_v20 }
 0x32b   :  { %v2723_v26 = vpop.f32.mrf.mxu0 }
 0x32c   :  { %v2278_v7 = vmax.f32 %v2273_v24, 0.0 }
 0x32e   :  { %v2280_v13 = vmul.f32 %v2279_v25, %v2278_v7 }
 0x330   :  { %v2281_v27 = vpack.c.bf16 %v2280_v13, %v2280_v13 }
 0x332   :  { %2751 = vmatmul.mubr.bf16.vlgmr.msra.gmra.mxu1 %v2281_v27 }
 0x3f2   :  { %v2387_v14 = vpop.f32.mrf.mxu1 }
 0x3f3   :  { %v2388_v28 = vadd.f32 %v2694_v17, %v2387_v14 }
 0x3f4   :  { %v2752_v51 = vpop.f32.mrf.mxu1 }
 0x3f5   :  { %2393 = vst [vmem:[#allocation2] sm:$0xff] %v2388_v28 }
 0x3f6   :  { %v2390_v29 = vpop.f32.mrf.mxu1 }
 0x3f7   :  { %3190 = shalt.err (!%p3187_p4)
}
 0x3f8   :  { %2403 = dma.vmem_to_hbm [thread:$0]  %s2401_s1, 128, %s4234_s12, [#allocation3]   ;;  %v2753_v30 = vpop.f32.mrf.mxu1 }
 0x3f9   :  { %3199 = dma.done.wait [#allocation3], 128  }
 0x3fa   :  { %3200 = vsyncadd [#allocation3], 4294967168 }
 0x3fb   :  { %2407 = vsyncpa [#allocation3], 1 }

</bundles_post_ra>
